<compile_context>
chip_gen: v5e
topology: v5e:2x2
jax: 0.10.0
libtpu: 0.0.40
codegen_flags: <defaults>
</compile_context>

<pallas_src>
import functools
import math

import jax
import jax.numpy as jnp
from jax.experimental import pallas as pl
from jax.experimental.pallas import tpu as pltpu

EPS = 1e-6  # added to std (not variance), exactly like the PyTorch reference

_TARGET_BLOCK_BYTES = 2 * 1024 * 1024   # ~85% of HBM roofline in mem-bound sweeps
_MAX_BLOCK_BYTES = 4 * 1024 * 1024      # keeps ~6x block in-flight < 32 MiB (v7x safe)
_VMEM_LIMIT_BYTES = 32 * 1024 * 1024    # raise v5e's 16 MiB default; safe on v6e/v7x


def _round_up(n, m):
    return ((n + m - 1) // m) * m


def _sublane_multiple(itemsize):
    # bf16 vregs pack (16,128), int8/fp8 pack (32,128).
    return {4: 8, 2: 16, 1: 32}.get(itemsize, 8)


def _pick_row_tile(rows, d_pad, sub):
    """Row-tile size: ~2 MiB blocks, capped at 4 MiB and at ~rows/4."""
    bytes_per_row = d_pad * 4  # f32 intermediates dominate the VMEM footprint
    tr = max(sub, (_TARGET_BLOCK_BYTES // bytes_per_row) // sub * sub)
    tr_cap = max(sub, (_MAX_BLOCK_BYTES // bytes_per_row) // sub * sub)
    tr = min(tr, tr_cap)
    # Keep >=4 grid steps whenever rows allow, so the "parallel" row axis can
    # be split across v7x's two TensorCores and the pipeline stays primed.
    quarter = _round_up(max(rows // 4, 1), sub)
    tr = min(tr, quarter)
    return max(tr, sub)


# ---------------------------------------------------------------------------
# Pallas kernel
# ---------------------------------------------------------------------------
def _layernorm_kernel(x_ref, alpha_ref, bias_ref, o_ref, *, true_d):
    """Normalize one (TR, D_pad) block along the last dim.

    x_ref : (TR, D_pad) VMEM
    alpha_ref, bias_ref : (1,) SMEM scalar parameters
    o_ref : (TR, D_pad) VMEM
    true_d : unpadded feature size (padded columns are zeros -> s1/s2 unchanged)
    """
    x = x_ref[...].astype(jnp.float32)                     # (TR, D_pad)
    inv_d = 1.0 / true_d
    inv_dm1 = 1.0 / max(true_d - 1, 1)                     # torch.std: unbiased

    # Single fused pass: sum and sum-of-squares -> mean & variance.
    # NOTE: one-pass variance can lose precision when |mean| >> std; fine for
    # typical LN inputs at the test tolerance below.
    s1 = jnp.sum(x, axis=-1, keepdims=True)                # (TR, 1)
    s2 = jnp.sum(x * x, axis=-1, keepdims=True)            # (TR, 1)
    mean = s1 * inv_d
    var = (s2 - true_d * mean * mean) * inv_dm1
    std = jnp.sqrt(jnp.maximum(var, 0.0))

    # Exact per-row reciprocal: (TR,1)-shaped, so the cost is negligible.
    inv = pl.reciprocal(std + EPS, approx=False)           # (TR, 1)

    # Fold alpha/mean/bias into per-row scale & shift -> two full-tile passes.
    scale = alpha_ref[0] * inv                              # (TR, 1)
    shift = bias_ref[0] - mean * scale                      # (TR, 1)
    o_ref[...] = (x * scale + shift).astype(o_ref.dtype)


# ---------------------------------------------------------------------------
# Wrapper
# ---------------------------------------------------------------------------
def layer_normalization(x, alpha, bias):
    """LayerNormalization over the last dim of x (any leading dims).

    Matches the PyTorch reference: unbiased std, eps added to std, scalar
    alpha/bias parameters.
    """
    *lead, d = x.shape
    rows = int(math.prod(lead)) if lead else 1
    x2 = x.reshape(rows, d)

    # Lane-dense feature dim: pad D to a multiple of 128 (zeros don't change
    # s1/s2; the kernel divides by the true D). No-op when D % 128 == 0.
    d_pad = _round_up(d, 128)
    if d_pad != d:
        x2 = jnp.pad(x2, ((0, 0), (0, d_pad - d)))

    sub = _sublane_multiple(x.dtype.itemsize)
    tr = _pick_row_tile(rows, d_pad, sub)
    grid = (pl.cdiv(rows, tr),)   # partial edge block clipped by Pallas

    out = pl.pallas_call(
        functools.partial(_layernorm_kernel, true_d=d),
        out_shape=jax.ShapeDtypeStruct((rows, d_pad), x.dtype),
        grid_spec=pltpu.PrefetchScalarGridSpec(
            num_scalar_prefetch=0,
            grid=grid,
            in_specs=[
                pl.BlockSpec((tr, d_pad), lambda r: (r, 0)),
                pl.BlockSpec(memory_space=pltpu.MemorySpace.SMEM),
                pl.BlockSpec(memory_space=pltpu.MemorySpace.SMEM),
            ],
            out_specs=pl.BlockSpec((tr, d_pad), lambda r: (r, 0)),
        ),
        compiler_params=pltpu.CompilerParams(
            dimension_semantics=("parallel",),
            vmem_limit_bytes=_VMEM_LIMIT_BYTES,
        ),
    )(x2, alpha, bias)

    if d_pad != d:
        out = out[:, :d]
    return out.reshape(x.shape)


# ---------------------------------------------------------------------------
# Demo / self-check
# ---------------------------------------------------------------------------
if __name__ == "__main__":
    # Small but lane-dense shapes: D = 128 (one full lane width), 1024 rows
    # total -> 4 grid steps (row tile capped at rows/4 for megacore split).
    B, S, D = 8, 128, 128

    key = jax.random.PRNGKey(0)
    kx, ka, kb = jax.random.split(key, 3)
    x = jax.random.normal(kx, (B, S, D), jnp.float32)
    # Scalar parameters (nn.Parameter(torch.ones(1)/zeros(1)); perturbed here
    # so the alpha/bias path is actually exercised).
    alpha = 1.0 + 0.1 * jax.random.normal(ka, (1,), jnp.float32)
    bias = 0.1 * jax.random.normal(kb, (1,), jnp.float32)

    out = layer_normalization(x, alpha, bias)
    jax.block_until_ready(out)

    # Pure-JAX reference with identical semantics (unbiased std, eps on std).
    mean = jnp.mean(x, axis=-1, keepdims=True)
    std = jnp.std(x, axis=-1, keepdims=True, ddof=1)
    ref = alpha[0] * (x - mean) / (std + EPS) + bias[0]

    assert out.shape == x.shape
    assert bool(jnp.all(jnp.isfinite(out)))
    assert bool(jnp.allclose(out, ref, rtol=2e-2, atol=2e-2)), (
        float(jnp.max(jnp.abs(out - ref))))

    print("KERNEL_OK")
</pallas_src>

<mosaic_0001>
module attributes {stable_mosaic.version = 11 : i64} {
  func.func @_layernorm_kernel(%arg0: i32, %arg1: memref<256x128xf32, #tpu.memory_space<vmem>>, %arg2: memref<1xf32, #tpu.memory_space<smem>>, %arg3: memref<1xf32, #tpu.memory_space<smem>>, %arg4: memref<256x128xf32, #tpu.memory_space<vmem>>) attributes {dimension_semantics = [#tpu.dimension_semantics<parallel>], iteration_bounds = array<i64: 4>, scalar_prefetch = 0 : i64, scratch_operands = 0 : i64, tpu.core_type = #tpu.core_type<tc>, window_params = [{transform_indices = @transform_0, window_bounds = array<i64: 256, 128>}, {transform_indices = @transform_1, window_bounds = array<i64: 1>}, {transform_indices = @transform_2, window_bounds = array<i64: 1>}, {transform_indices = @transform_3, window_bounds = array<i64: 256, 128>}]} {
    %c0 = arith.constant 0 : index
    %c0_0 = arith.constant 0 : index
    %0 = vector.load %arg1[%c0, %c0_0] : memref<256x128xf32, #tpu.memory_space<vmem>>, vector<256x128xf32>
    %cst = arith.constant dense<0.000000e+00> : vector<256xf32>
    %1 = vector.multi_reduction <add>, %0, %cst [1] : vector<256x128xf32> to vector<256xf32>
    %2 = vector.shape_cast %1 : vector<256xf32> to vector<256x1xf32>
    %3 = arith.mulf %0, %0 : vector<256x128xf32>
    %cst_1 = arith.constant dense<0.000000e+00> : vector<256xf32>
    %4 = vector.multi_reduction <add>, %3, %cst_1 [1] : vector<256x128xf32> to vector<256xf32>
    %5 = vector.shape_cast %4 : vector<256xf32> to vector<256x1xf32>
    %cst_2 = arith.constant 7.812500e-03 : f32
    %6 = vector.broadcast %cst_2 : f32 to vector<256x1xf32>
    %7 = arith.mulf %2, %6 : vector<256x1xf32>
    %cst_3 = arith.constant 1.280000e+02 : f32
    %8 = vector.broadcast %cst_3 : f32 to vector<256x1xf32>
    %9 = arith.mulf %8, %7 : vector<256x1xf32>
    %10 = arith.mulf %9, %7 : vector<256x1xf32>
    %11 = arith.subf %5, %10 : vector<256x1xf32>
    %cst_4 = arith.constant 0.00787401571 : f32
    %12 = vector.broadcast %cst_4 : f32 to vector<256x1xf32>
    %13 = arith.mulf %11, %12 : vector<256x1xf32>
    %cst_5 = arith.constant 0.000000e+00 : f32
    %14 = vector.broadcast %cst_5 : f32 to vector<256x1xf32>
    %15 = arith.maximumf %13, %14 : vector<256x1xf32>
    %16 = math.sqrt %15 : vector<256x1xf32>
    %cst_6 = arith.constant 9.99999997E-7 : f32
    %17 = vector.broadcast %cst_6 : f32 to vector<256x1xf32>
    %18 = arith.addf %16, %17 : vector<256x1xf32>
    %19 = tpu.reciprocal %18 : vector<256x1xf32> -> vector<256x1xf32>
    %c0_7 = arith.constant 0 : index
    %20 = memref.load %arg2[%c0_7] : memref<1xf32, #tpu.memory_space<smem>>
    %21 = vector.broadcast %20 : f32 to vector<256x1xf32>
    %22 = arith.mulf %21, %19 : vector<256x1xf32>
    %c0_8 = arith.constant 0 : index
    %23 = memref.load %arg3[%c0_8] : memref<1xf32, #tpu.memory_space<smem>>
    %24 = arith.mulf %7, %22 : vector<256x1xf32>
    %25 = vector.broadcast %23 : f32 to vector<256x1xf32>
    %26 = arith.subf %25, %24 : vector<256x1xf32>
    %27 = vector.broadcast %22 : vector<256x1xf32> to vector<256x128xf32>
    %28 = arith.mulf %0, %27 : vector<256x128xf32>
    %29 = vector.broadcast %26 : vector<256x1xf32> to vector<256x128xf32>
    %30 = arith.addf %28, %29 : vector<256x128xf32>
    %c0_9 = arith.constant 0 : index
    %c0_10 = arith.constant 0 : index
    %31 = vector.load %arg4[%c0_9, %c0_10] : memref<256x128xf32, #tpu.memory_space<vmem>>, vector<256x128xf32>
    tpu.vector_store %arg4[%c0_9, %c0_10], %30 {strides = array<i32>} : memref<256x128xf32, #tpu.memory_space<vmem>>, vector<256x128xf32>,
    return
  }
  func.func @transform_0(%arg0: i32) -> (i32, i32) {
    %c0_i32 = arith.constant 0 : i32
    %c0_i32_0 = arith.constant 0 : i32
    return %arg0, %c0_i32 : i32, i32
  }
  func.func @transform_1(%arg0: i32) -> i32 {
    %c0_i32 = arith.constant 0 : i32
    %c0_i32_0 = arith.constant 0 : i32
    return %c0_i32 : i32
  }
  func.func @transform_2(%arg0: i32) -> i32 {
    %c0_i32 = arith.constant 0 : i32
    %c0_i32_0 = arith.constant 0 : i32
    return %c0_i32 : i32
  }
  func.func @transform_3(%arg0: i32) -> (i32, i32) {
    %c0_i32 = arith.constant 0 : i32
    %c0_i32_0 = arith.constant 0 : i32
    return %arg0, %c0_i32 : i32, i32
  }
}

</mosaic_0001>

<bundles_post_ra>
// kernel: tpu_custom_call.1
= control target key start
LH: loop header
LB: loop body
LE: loop exit
PB: predicated region body
PF: predicated region fallthrough
CT: control target
= control target key end

     0   :  { %s3566_s0 = inlined_call_operand.hbm [shape: f32[1024,128], index: 0, kind: input, shape index: {}]   ;;  %s3567_s1 = inlined_call_operand.<no memory space> [shape: f32[1], index: 1, kind: input, shape index: {}]   ;;  %s3568_s2 = inlined_call_operand.<no memory space> [shape: f32[1], index: 2, kind: input, shape index: {}]   ;;  %s3569_s3 = inlined_call_operand.hbm [shape: f32[1024,128], index: 3, kind: output, shape index: {}]  }
   0x1   :  { %8 = sst [smem:[#allocation2]] %s3567_s1 }
   0x2   :  { %9 = sst [smem:[#allocation3]] %s3568_s2 }
   0x3   :  { %10 = vsyncpa [#allocation5], 0 }
   0x4   :  { %12 = vsyncpa [#allocation5 + $0x1], 0 }
   0x5   :  { %13 = vsyncpa [#allocation6], 0 }
   0x6   :  { %15 = vsyncpa [#allocation6 + $0x1], 0  ;;  %s2076_s16 = smov 0   ;;  %s2078_s17 = smov 0  }
   0x7   :  { %s2080_s18 = smov 0   ;;  %s2082_s19 = smov 0  }
   0x8 LB: > { %s2097_s1 = sadd.s32 4294967295, %s2044_s19   ;;  %s1728_s2 = sadd.s32 4294967294, %s2044_s19   ;;  %s2044_s19 = sphi %s2082_s19, %s3644_s19   ;;  %s2040_s18 = sphi %s2080_s18, %s3643_s18   ;;  %s2036_s17 = sphi %s2078_s17, %s3642_s17   ;;  %s2032_s16 = sphi %s2076_s16, %s3641_s16  }
   0x9   : > { %s2101_s20 = sadd.s32 1, %s2044_s19   ;;  %s28_s21 = sadd.s32 1, %s2040_s18 }
   0xa   : > { %s25_s22 = ssub.s32 %s2044_s19, %s2101_s20  ;;  %p35_p0 = scmp.ne.s32.totalorder %s2040_s18, %s2036_s17 }
   0xb   : > { %p26_p1 = scmp.eq.s32.totalorder %s25_s22, 0  ;;  %p36_p2 = scmp.eq.s32.totalorder %s2044_s19, 0 }
   0xc   : > { %p41_p3 = scmp.ne.s32.totalorder %s2036_s17, %s2032_s16  ;;  %p42_p4 = scmp.eq.s32.totalorder %s2097_s1, 0 }
   0xd   : > { %s2113_s23 = scalar_select %p26_p1, %s2040_s18, %s28_s21  }
   0xe   : > { %p2115_p5 = por %p36_p2, %p35_p0  ;;  %p2119_p6 = por %p42_p4, %p41_p3 }
   0xf   : > { %p107_p7 = scmp.eq.s32.totalorder %s2097_s1, 3  ;;  %p113_p8 = scmp.eq.s32.totalorder %s1728_s2, 3 }
  0x10   : > { %p1756_p9 = scmp.lt.s32.totalorder %s2044_s19, 4  ;;  %s139_s28 = sand.u32 1, %s2040_s18  }
  0x11   : > { %p2125_p10 = por %p107_p7, %p35_p0  ;;  %p2129_p11 = por %p113_p8, %p41_p3 }
  0x12   : > { %s1742_s29 = sshll.u32 %s2044_s19, 8  ;;  %s1731_s30 = sshll.u32 %s139_s28, 8 }
  0x13   : > { %s148_s6 = scalar_lea.hbm %s3566_s0, %s1742_s29  ;;  %s143_s8 = scalar_lea.vmem [#allocation4], %s1731_s30 }
  0x14   : > { %s149_s7 = sshll.u32 %s148_s6, 4  ;;  %s151_s9 = sshll.u32 %s143_s8, 4  ;;  %s150_s7 = int_to_ptr.hbm [resolvable:$true] %s149_s7  ;;  %s152_s9 = int_to_ptr.vmem [resolvable:$true] %s151_s9 }
  0x15   : > { %p2140_p12 = pnand %p1756_p9, %p2115_p5  ;;  %p1734_p13 = scmp.ge.s32.totalorder %s2044_s19, 1 }
  0x16   : > { %p159_p0 = scmp.lt.s32.totalorder %s2044_s19, 5  ;;  %s140_s11 = scalar_lea.sflag [#allocation5], %s139_s28 }
  0x17   : > { %s1948_s12 = sshra.s32 %s150_s7, 4  ;;  %p1952_p2 = pneg %p2140_p12  ;;  %s1949_s12 = int_to_ptr.hbm [resolvable:$true] %s1948_s12 }
  0x18   : > { %s1950_s13 = scalar_lea.hbm %s1949_s12, 256  ;;  %s1955_s2 = scalar_lea.hbm %s3566_s0, 1024 }
  0x19   : > { %p1951_p1 = scmp.ne.s32.totalorder %s1949_s12, %s1950_s13  ;;  %p1956_p5 = scmp.lt.s32.totalorder %s1949_s12, %s3566_s0 }
  0x1a   : > { %p1957_p7 = scmp.lt.s32.totalorder %s1955_s2, %s1950_s13 }
  0x1b   : > { %p1953_p3 = pnand %p1952_p2, %p1951_p1 }
  0x1c   : > { %p1958_p8 = por %p1957_p7, %p1956_p5 }
  0x1d   : > { %p1954_p4 = pneg %p1953_p3 }
  0x1f   : > { %p1959_p9 = pnand %p1958_p8, %p1954_p4 }
  0x21   : > { %1962 = shalt.err (!%p1959_p9)
}
  0x22   : > { %s2046_s24 = smov 128   ;;  %s2047_s28 = smov 8  }
  0x23   : > { %1751 = dma.hbm_to_vmem [thread:$0]  (!%p2140_p12), %s150_s7, 4096, %s152_s9, %s140_s11, %s2046_s24, %s2046_s24, %s2047_s28  }
  0x24   : > { %p160_p1 = pnand %p1734_p13, %p159_p0 }
  0x26   : > { %163 = sbr.rel (%p160_p1) target bundleno = 565 (0x235), region = 32 }
  0x2b   : > { %s2161_s29 = sand.u32 1, %s2036_s17  }
  0x2c   : > { %s1735_s30 = sshll.u32 %s2161_s29, 8  ;;  %s166_s4 = scalar_lea.sflag [#allocation5], %s2161_s29 }
  0x2d   : > { %s2167_s5 = scalar_lea.vmem [#allocation4], %s1735_s30 }
  0x2e   : > { %2023 = dma.done.wait (%p2119_p6), %s166_s4, 4096  }
  0x2f   : > { %2025 = vsyncadd (%p2119_p6), %s166_s4, 4294963200  ;;  %v2174_v0 = vld [vmem:[%s2167_s5 + $0x20] sm:$0xff]  ;;  %v2177_v1 = vld [vmem:[%s2167_s5 + $0x10] sm:$0xff]  ;;  %s2452_s25 = sld [smem:[#allocation2]]  ;;  %s2668_s7 = scalar_lea.vmem [#allocation7], %s1735_s30 }
  0x30   : > { %v2180_v2 = vld [vmem:[%s2167_s5] sm:$0xff]  ;;  %235 = vadd.xlane.f32.xlu2 %v2174_v0  ;;  %231 = vadd.xlane.f32.xlu1 %v2177_v1  ;;  %v2186_v3 = vld [vmem:[%s2167_s5 + $0x28] sm:$0xff]  ;;  %v2189_v4 = vld [vmem:[%s2167_s5 + $0x18] sm:$0xff]  ;;  %v293_v33 = vmul.f32 %v2177_v1, %v2177_v1  ;;  %v295_v38 = vmul.f32 %v2174_v0, %v2174_v0  ;;  %s2491_s6 = sld [smem:[#allocation3]]  ;;  %s1743_s8 = sshll.u32 %s2097_s1, 8 }
  0x31   : > { %227 = vadd.xlane.f32.xlu0 %v2180_v2  ;;  %v2192_v5 = vld [vmem:[%s2167_s5 + $0x8] sm:$0xff]  ;;  %v2198_v6 = vld [vmem:[%s2167_s5 + $0x40] sm:$0xff]  ;;  %v2201_v7 = vld [vmem:[%s2167_s5 + $0x38] sm:$0xff]  ;;  %v291_v30 = vmul.f32 %v2180_v2, %v2180_v2  ;;  %v294_v34 = vmul.f32 %v2189_v4, %v2189_v4  ;;  %v296_v36 = vmul.f32 %v2186_v3, %v2186_v3  ;;  %s1651_s11 = scalar_lea.hbm %s3569_s3, %s1743_s8  ;;  %s1652_s1 = sshll.u32 %s2668_s7, 4  ;;  %s1653_s1 = int_to_ptr.vmem [resolvable:$true] %s1652_s1 }
  0x32   : > { %v201_v8 = vld [vmem:[%s2167_s5 + $0x30] sm:$0xff]  ;;  %v2207_v9 = vld [vmem:[%s2167_s5 + $0x58] sm:$0xff]  ;;  %v204_v11 = vld [vmem:[%s2167_s5 + $0x48] sm:$0xff]  ;;  %v292_v35 = vmul.f32 %v2192_v5, %v2192_v5  ;;  %v299_v39 = vmul.f32 %v2198_v6, %v2198_v6  ;;  %v298_v41 = vmul.f32 %v2201_v7, %v2201_v7  ;;  %s1654_s12 = sshll.u32 %s1651_s11, 4  ;;  %s1640_s13 = scalar_lea.sflag [#allocation6], %s2161_s29  ;;  %s1655_s12 = int_to_ptr.hbm [resolvable:$true] %s1654_s12 }
  0x33   : > { %v2210_v10 = vld [vmem:[%s2167_s5 + $0x50] sm:$0xff]  ;;  %v2219_v13 = vld [vmem:[%s2167_s5 + $0x68] sm:$0xff]  ;;  %v207_v14 = vld [vmem:[%s2167_s5 + $0x60] sm:$0xff]  ;;  %v297_v37 = vmul.f32 %v201_v8, %v201_v8  ;;  %v300_v40 = vmul.f32 %v204_v11, %v204_v11  ;;  %v302_v42 = vmul.f32 %v2207_v9, %v2207_v9  ;;  %s1992_s14 = sshra.s32 %s1655_s12, 4  ;;  %s1998_s22 = scalar_lea.hbm %s3569_s3, 1024  ;;  %s1993_s14 = int_to_ptr.hbm [resolvable:$true] %s1992_s14 }
  0x34   : > { %v2216_v12 = vld [vmem:[%s2167_s5 + $0x70] sm:$0xff]  ;;  %v2225_v15 = vld [vmem:[%s2167_s5 + $0x88] sm:$0xff]  ;;  %v2228_v16 = vld [vmem:[%s2167_s5 + $0x80] sm:$0xff]  ;;  %v303_v43 = vmul.f32 %v207_v14, %v207_v14  ;;  %v301_v44 = vmul.f32 %v2210_v10, %v2210_v10  ;;  %v304_v50 = vmul.f32 %v2219_v13, %v2219_v13  ;;  %s1994_s15 = scalar_lea.hbm %s1993_s14, 256  ;;  %p1999_p0 = scmp.lt.s32.totalorder %s1993_s14, %s3569_s3 }
  0x35   : > { %v210_v17 = vld [vmem:[%s2167_s5 + $0x78] sm:$0xff]  ;;  %v2234_v18 = vld [vmem:[%s2167_s5 + $0xa0] sm:$0xff]  ;;  %v2240_v20 = vld [vmem:[%s2167_s5 + $0x90] sm:$0xff]  ;;  %v305_v48 = vmul.f32 %v2216_v12, %v2216_v12  ;;  %v308_v54 = vmul.f32 %v2225_v15, %v2225_v15  ;;  %v307_v56 = vmul.f32 %v2228_v16, %v2228_v16  ;;  %p1995_p6 = scmp.ne.s32.totalorder %s1993_s14, %s1994_s15  ;;  %p2000_p2 = scmp.lt.s32.totalorder %s1998_s22, %s1994_s15 }
  0x36   : > { %v2237_v19 = vld [vmem:[%s2167_s5 + $0x98] sm:$0xff]  ;;  %v2249_v22 = vld [vmem:[%s2167_s5 + $0xb0] sm:$0xff]  ;;  %v2252_v23 = vld [vmem:[%s2167_s5 + $0xa8] sm:$0xff]  ;;  %v306_v49 = vmul.f32 %v210_v17, %v210_v17  ;;  %v309_v55 = vmul.f32 %v2240_v20, %v2240_v20  ;;  %v311_v60 = vmul.f32 %v2234_v18, %v2234_v18 }
  0x37   : > { %v2246_v21 = vld [vmem:[%s2167_s5 + $0xb8] sm:$0xff]  ;;  %v2258_v24 = vld [vmem:[%s2167_s5 + $0xd0] sm:$0xff]  ;;  %v2261_v25 = vld [vmem:[%s2167_s5 + $0xc8] sm:$0xff]  ;;  %v312_v61 = vmul.f32 %v2252_v23, %v2252_v23  ;;  %v310_v62 = vmul.f32 %v2237_v19, %v2237_v19  ;;  %p1996_p12 = pnand %p1995_p6, %p2125_p10  ;;  %p2001_p3 = por %p2000_p2, %p1999_p0 }
  0x38   : > { %237 = vadd.xlane.f32.xlu2 %v2186_v3  ;;  %233 = vadd.xlane.f32.xlu1 %v2189_v4  ;;  %v2264_v26 = vld [vmem:[%s2167_s5 + $0xc0] sm:$0xff]  ;;  %v2270_v27 = vld [vmem:[%s2167_s5 + $0xe8] sm:$0xff]  ;;  %v2276_v29 = vld [vmem:[%s2167_s5 + $0xd8] sm:$0xff] }
  0x39   : > { %229 = vadd.xlane.f32.xlu0 %v2192_v5  ;;  %v2273_v28 = vld [vmem:[%s2167_s5 + $0xe0] sm:$0xff]  ;;  %v2284_v31 = vld [vmem:[%s2167_s5 + $0xf8] sm:$0xff]  ;;  %v2287_v32 = vld [vmem:[%s2167_s5 + $0xf0] sm:$0xff]  ;;  %p1997_p13 = pneg %p1996_p12 }
  0x3b   : > { %p2002_p4 = pnand %p2001_p3, %p1997_p13 }
  0x40   : > { %243 = vadd.xlane.f32.xlu2 %v2198_v6  ;;  %241 = vadd.xlane.f32.xlu1 %v2201_v7 }
  0x41   : > { %239 = vadd.xlane.f32.xlu0 %v201_v8  ;;  %v314_v8 = vmul.f32 %v2246_v21, %v2246_v21 }
  0x48   : > { %249 = vadd.xlane.f32.xlu2 %v2207_v9  ;;  %247 = vadd.xlane.f32.xlu1 %v2210_v10  ;;  %v315_v9 = vmul.f32 %v2264_v26, %v2264_v26  ;;  %v313_v10 = vmul.f32 %v2249_v22, %v2249_v22 }
  0x49   : > { %245 = vadd.xlane.f32.xlu0 %v204_v11 }
  0x50   : > { %255 = vadd.xlane.f32.xlu2 %v2216_v12  ;;  %253 = vadd.xlane.f32.xlu1 %v2219_v13 }
  0x51   : > { %251 = vadd.xlane.f32.xlu0 %v207_v14  ;;  %v317_v14 = vmul.f32 %v2258_v24, %v2258_v24 }
  0x58   : > { %261 = vadd.xlane.f32.xlu2 %v2225_v15  ;;  %259 = vadd.xlane.f32.xlu1 %v2228_v16  ;;  %v318_v15 = vmul.f32 %v2276_v29, %v2276_v29  ;;  %v316_v16 = vmul.f32 %v2261_v25, %v2261_v25 }
  0x59   : > { %257 = vadd.xlane.f32.xlu0 %v210_v17 }
  0x60   : > { %267 = vadd.xlane.f32.xlu2 %v2234_v18  ;;  %265 = vadd.xlane.f32.xlu1 %v2237_v19 }
  0x61   : > { %263 = vadd.xlane.f32.xlu0 %v2240_v20  ;;  %v320_v20 = vmul.f32 %v2270_v27, %v2270_v27 }
  0x68   : > { %273 = vadd.xlane.f32.xlu2 %v2246_v21  ;;  %271 = vadd.xlane.f32.xlu1 %v2249_v22  ;;  %v321_v21 = vmul.f32 %v2287_v32, %v2287_v32  ;;  %v319_v22 = vmul.f32 %v2273_v28, %v2273_v28 }
  0x69   : > { %269 = vadd.xlane.f32.xlu0 %v2252_v23 }
  0x70   : > { %279 = vadd.xlane.f32.xlu2 %v2258_v24  ;;  %277 = vadd.xlane.f32.xlu1 %v2261_v25 }
  0x71   : > { %275 = vadd.xlane.f32.xlu0 %v2264_v26  ;;  %v322_v26 = vmul.f32 %v2284_v31, %v2284_v31 }
  0x78   : > { %285 = vadd.xlane.f32.xlu2 %v2270_v27  ;;  %283 = vadd.xlane.f32.xlu1 %v2273_v28 }
  0x79   : > { %281 = vadd.xlane.f32.xlu0 %v2276_v29 }
  0x80   : > { %289 = vadd.xlane.f32.xlu1 %v2284_v31  ;;  %323 = vadd.xlane.f32.xlu2 %v291_v30 }
  0x81   : > { %287 = vadd.xlane.f32.xlu0 %v2287_v32 }
  0x88   : > { %327 = vadd.xlane.f32.xlu1 %v293_v33  ;;  %329 = vadd.xlane.f32.xlu2 %v294_v34 }
  0x89   : > { %325 = vadd.xlane.f32.xlu0 %v292_v35 }
  0x90   : > { %333 = vadd.xlane.f32.xlu1 %v296_v36  ;;  %335 = vadd.xlane.f32.xlu2 %v297_v37 }
  0x91   : > { %331 = vadd.xlane.f32.xlu0 %v295_v38 }
  0x98   : > { %339 = vadd.xlane.f32.xlu1 %v299_v39  ;;  %341 = vadd.xlane.f32.xlu2 %v300_v40 }
  0x99   : > { %337 = vadd.xlane.f32.xlu0 %v298_v41 }
  0xa0   : > { %345 = vadd.xlane.f32.xlu1 %v302_v42  ;;  %347 = vadd.xlane.f32.xlu2 %v303_v43 }
  0xa1   : > { %343 = vadd.xlane.f32.xlu0 %v301_v44 }
  0xa3   : > { %v2309_v45 = vpop.xlane.xlu2 %235  ;;  %v2311_v46 = vpop.xlane.xlu1 %231 }
  0xa4   : > { %v228_v47 = vpop.xlane.xlu0 %227  ;;  %v2403_v38 = vmul.f32 0.0078125, %v2311_v46 }
  0xa5   : > { %v2393_v34 = vmul.f32 0.0078125, %v228_v47 }
  0xa7   : > { %v419_v37 = vmul.f32 128.0, %v2393_v34 }
  0xa8   : > { %351 = vadd.xlane.f32.xlu1 %v305_v48  ;;  %353 = vadd.xlane.f32.xlu2 %v306_v49  ;;  %v421_v49 = vmul.f32 128.0, %v2403_v38 }
  0xa9   : > { %349 = vadd.xlane.f32.xlu0 %v304_v50  ;;  %v451_v40 = vmul.f32 %v419_v37, %v2393_v34 }
  0xab   : > { %v2317_v51 = vpop.xlane.xlu2 %237  ;;  %v234_v52 = vpop.xlane.xlu1 %233 }
  0xac   : > { %v230_v53 = vpop.xlane.xlu0 %229  ;;  %v2405_v39 = vmul.f32 0.0078125, %v234_v52  ;;  %v2420_v52 = vmul.f32 0.0078125, %v2309_v45 }
  0xad   : > { %v2408_v41 = vmul.f32 0.0078125, %v230_v53  ;;  %v2423_v53 = vmul.f32 0.0078125, %v2317_v51 }
  0xae   : > { %v422_v50 = vmul.f32 128.0, %v2405_v39 }
  0xaf   : > { %v420_v46 = vmul.f32 128.0, %v2408_v41 }
  0xb0   : > { %357 = vadd.xlane.f32.xlu1 %v308_v54  ;;  %359 = vadd.xlane.f32.xlu2 %v309_v55 }
  0xb1   : > { %355 = vadd.xlane.f32.xlu0 %v307_v56 }
  0xb3   : > { %v2325_v57 = vpop.xlane.xlu2 %243  ;;  %v2327_v58 = vpop.xlane.xlu1 %241 }
  0xb4   : > { %v2329_v59 = vpop.xlane.xlu0 %239  ;;  %v2426_v55 = vmul.f32 0.0078125, %v2325_v57 }
  0xb5   : > { %v2429_v56 = vmul.f32 0.0078125, %v2329_v59  ;;  %v424_v59 = vmul.f32 128.0, %v2423_v53 }
  0xb8   : > { %363 = vadd.xlane.f32.xlu1 %v311_v60  ;;  %365 = vadd.xlane.f32.xlu2 %v312_v61  ;;  %v453_v60 = vmul.f32 %v421_v49, %v2403_v38  ;;  %v454_v61 = vmul.f32 %v422_v50, %v2405_v39 }
  0xb9   : > { %361 = vadd.xlane.f32.xlu0 %v310_v62  ;;  %v2435_v62 = vmul.f32 0.0078125, %v2327_v58 }
  0xbb   : > { %v2337_v63 = vpop.xlane.xlu2 %249  ;;  %v2339_v6 = vpop.xlane.xlu1 %247  ;;  %v426_v37 = vmul.f32 128.0, %v2435_v62 }
  0xbc   : > { %v2341_v7 = vpop.xlane.xlu0 %245 }
  0xc0   : > { %369 = vadd.xlane.f32.xlu1 %v314_v8  ;;  %371 = vadd.xlane.f32.xlu2 %v315_v9  ;;  %v452_v8 = vmul.f32 %v420_v46, %v2408_v41  ;;  %v456_v46 = vmul.f32 %v424_v59, %v2423_v53 }
  0xc1   : > { %367 = vadd.xlane.f32.xlu0 %v313_v10 }
  0xc3   : > { %v2349_v11 = vpop.xlane.xlu2 %255  ;;  %v2351_v12 = vpop.xlane.xlu1 %253 }
  0xc4   : > { %v2353_v13 = vpop.xlane.xlu0 %251 }
  0xc8   : > { %375 = vadd.xlane.f32.xlu1 %v317_v14  ;;  %377 = vadd.xlane.f32.xlu2 %v318_v15  ;;  %v423_v15 = vmul.f32 128.0, %v2420_v52 }
  0xc9   : > { %373 = vadd.xlane.f32.xlu0 %v316_v16  ;;  %v427_v16 = vmul.f32 128.0, %v2426_v55 }
  0xcb   : > { %v2361_v17 = vpop.xlane.xlu2 %261  ;;  %v2363_v18 = vpop.xlane.xlu1 %259 }
  0xcc   : > { %v2365_v19 = vpop.xlane.xlu0 %257 }
  0xd0   : > { %381 = vadd.xlane.f32.xlu1 %v320_v20  ;;  %383 = vadd.xlane.f32.xlu2 %v321_v21  ;;  %v2442_v20 = vmul.f32 0.0078125, %v2341_v7 }
  0xd1   : > { %379 = vadd.xlane.f32.xlu0 %v319_v22  ;;  %v425_v22 = vmul.f32 128.0, %v2429_v56 }
  0xd3   : > { %v2373_v23 = vpop.xlane.xlu2 %267  ;;  %v2375_v24 = vpop.xlane.xlu1 %265 }
  0xd4   : > { %3578 = vst [vmem:[#allocation10_spill] sm:$0xff] %v2373_v23  ;;  %v2377_v25 = vpop.xlane.xlu0 %263 }
  0xd5   : > { %3579 = vst [vmem:[#allocation11_spill] sm:$0xff] %v2375_v24 }
  0xd6   : > { %3580 = vst [vmem:[#allocation12_spill] sm:$0xff] %v2377_v25 }
  0xd9   : > { %385 = vadd.xlane.f32.xlu0 %v322_v26 }
  0xdb   : > { %v2381_v27 = vpop.xlane.xlu2 %273  ;;  %v2383_v29 = vpop.xlane.xlu1 %271 }
  0xdc   : > { %3581 = vst [vmem:[#allocation13_spill] sm:$0xff] %v2381_v27  ;;  %v2385_v30 = vpop.xlane.xlu0 %269 }
  0xdd   : > { %3582 = vst [vmem:[#allocation14_spill] sm:$0xff] %v2383_v29 }
  0xde   : > { %3583 = vst [vmem:[#allocation15_spill] sm:$0xff] %v2385_v30 }
  0xe3   : > { %v2387_v28 = vpop.xlane.xlu2 %279  ;;  %v2389_v32 = vpop.xlane.xlu1 %277 }
  0xe4   : > { %3584 = vst [vmem:[#allocation16_spill] sm:$0xff] %v2387_v28  ;;  %v2391_v33 = vpop.xlane.xlu0 %275 }
  0xe5   : > { %3585 = vst [vmem:[#allocation17_spill] sm:$0xff] %v2389_v32 }
  0xe6   : > { %3586 = vst [vmem:[#allocation18_spill] sm:$0xff] %v2391_v33 }
  0xeb   : > { %v2395_v35 = vpop.xlane.xlu2 %285  ;;  %v2397_v36 = vpop.xlane.xlu1 %283 }
  0xec   : > { %3587 = vst [vmem:[#allocation19_spill] sm:$0xff] %v2395_v35  ;;  %v2399_v31 = vpop.xlane.xlu0 %281 }
  0xed   : > { %3588 = vst [vmem:[#allocation20_spill] sm:$0xff] %v2397_v36 }
  0xee   : > { %3589 = vst [vmem:[#allocation21_spill] sm:$0xff] %v2399_v31  ;;  %v2527_v31 = vstv %s2491_s6 }
  0xf3   : > { %v2410_v42 = vpop.xlane.xlu1 %289  ;;  %v324_v43 = vpop.xlane.xlu2 %323 }
  0xf4   : > { %3590 = vst [vmem:[#allocation22_spill] sm:$0xff] %v2410_v42  ;;  %v2412_v44 = vpop.xlane.xlu0 %287  ;;  %v483_v47 = vsub.f32 %v324_v43, %v451_v40  ;;  %v2447_v43 = vmul.f32 0.0078125, %v2337_v63  ;;  %v457_v63 = vmul.f32 %v425_v22, %v2429_v56  ;;  %v2486_v22 = vmul.f32 0.0078125, %v2361_v17 }
  0xf5   : > { %3591 = vst [vmem:[#allocation23_spill] sm:$0xff] %v2412_v44 }
  0xf6   : > { %v515_v48 = vmul.f32 0.007874016, %v483_v47  ;;  %v2450_v47 = vmul.f32 0.0078125, %v2339_v6  ;;  %v2466_v6 = vmul.f32 %v427_v16, %v2426_v55  ;;  %v430_v59 = vmul.f32 128.0, %v2447_v43 }
  0xf8   : > { %v2417_v54 = vmax.f32 %v515_v48, 0.0  ;;  %3592 = vst [vmem:[#allocation24_spill] sm:$0xff] %v2450_v47 }
  0xfa   : > { %1794 = vrsqrt.f32 %v2417_v54  ;;  %vm586_vm0 = vcmp.eq.f32.partialorder %v2417_v54, inf  ;;  %vm588_vm1 = vcmp.eq.f32.partialorder %v2417_v54, 0.0 }
  0xfb   : > { %v328_v45 = vpop.xlane.xlu1 %327  ;;  %v330_v51 = vpop.xlane.xlu2 %329 }
  0xfc   : > { %v485_v9 = vsub.f32 %v328_v45, %v453_v60  ;;  %v326_v10 = vpop.xlane.xlu0 %325  ;;  %v486_v57 = vsub.f32 %v330_v51, %v454_v61  ;;  %v455_v60 = vmul.f32 %v423_v15, %v2420_v52  ;;  %v428_v61 = vmul.f32 128.0, %v2442_v20 }
  0xfd   : > { %v484_v14 = vsub.f32 %v326_v10, %v452_v8  ;;  %v2470_v45 = vmul.f32 0.0078125, %v2349_v11  ;;  %v2474_v10 = vmul.f32 %v426_v37, %v2435_v62  ;;  %v429_v11 = vmul.f32 128.0, %v2450_v47 }
  0xfe   : > { %v517_v21 = vmul.f32 0.007874016, %v485_v9  ;;  %v518_v58 = vmul.f32 0.007874016, %v486_v57  ;;  %v2477_v57 = vmul.f32 0.0078125, %v2351_v12  ;;  %v2483_v15 = vmul.f32 0.0078125, %v2353_v13 }
  0xff   : > { %v516_v26 = vmul.f32 0.007874016, %v484_v14  ;;  %3593 = vst [vmem:[#allocation25_spill] sm:$0xff] %v2470_v45  ;;  %v2489_v12 = vmul.f32 0.0078125, %v2363_v18  ;;  %v2494_v37 = vmul.f32 %v428_v61, %v2442_v20  ;;  %v2506_v18 = vmul.f32 %v429_v11, %v2450_v47 }
 0x100   : > { %v1795_v40 = vpop.eup %1794  ;;  %v2454_v48 = vmax.f32 %v517_v21, 0.0  ;;  %v2456_v7 = vmax.f32 %v518_v58, 0.0  ;;  %3594 = vst [vmem:[#allocation26_spill] sm:$0xff] %v2483_v15 }
 0x101   : > { %v580_v49 = vmul.f32 %v1795_v40, %v2417_v54  ;;  %v2459_v50 = vmax.f32 %v516_v26, 0.0 }
 0x102   : > { %1796 = vrsqrt.f32 %v2454_v48  ;;  %vm610_vm2 = vcmp.eq.f32.partialorder %v2454_v48, inf  ;;  %vm612_vm3 = vcmp.eq.f32.partialorder %v2454_v48, 0.0  ;;  %vm622_vm6 = vcmp.eq.f32.partialorder %v2456_v7, inf }
 0x103   : > { %v581_v8 = vmul.f32 %v1795_v40, %v580_v49  ;;  %1798 = vrsqrt.f32 %v2459_v50  ;;  %v334_v51 = vpop.xlane.xlu1 %333  ;;  %v336_v9 = vpop.xlane.xlu2 %335  ;;  %v2497_v49 = vmul.f32 0.0078125, %v2365_v19  ;;  %vm598_vm4 = vcmp.eq.f32.partialorder %v2459_v50, inf }
 0x104   : > { %1800 = vrsqrt.f32 %v2456_v7  ;;  %v332_v14 = vpop.xlane.xlu0 %331  ;;  %v488_v21 = vsub.f32 %v334_v51, %v456_v46  ;;  %v489_v26 = vsub.f32 %v336_v9, %v457_v63  ;;  %v2503_v51 = vmul.f32 %v430_v59, %v2447_v43 }
 0x105   : > { %v582_v16 = vmul.f32 0.5, %v581_v8  ;;  %v487_v58 = vsub.f32 %v332_v14, %v455_v60  ;;  %v2500_v60 = vstv %s2452_s25  ;;  %v431_v59 = vmul.f32 128.0, %v2483_v15 }
 0x106   : > { %v520_v42 = vmul.f32 0.007874016, %v488_v21  ;;  %v521_v17 = vmul.f32 0.007874016, %v489_v26  ;;  %vm600_vm5 = vcmp.eq.f32.partialorder %v2459_v50, 0.0  ;;  %vm624_vm7 = vcmp.eq.f32.partialorder %v2456_v7, 0.0 }
 0x107   : > { %v583_v13 = vsub.f32 1.5, %v582_v16  ;;  %v519_v8 = vmul.f32 0.007874016, %v487_v58  ;;  %v433_v58 = vmul.f32 128.0, %v2470_v45  ;;  %v2530_v33 = vmul.f32 %v431_v59, %v2483_v15 }
 0x108   : > { %v1797_v46 = vpop.eup %1796  ;;  %v2509_v14 = vmax.f32 %v520_v42, 0.0  ;;  %v589_v42 = vand.u32 2147483648, %v2417_v54 }
 0x109   : > { %v1799_v63 = vpop.eup %1798  ;;  %v584_v9 = vmul.f32 %v1795_v40, %v583_v13  ;;  %v604_v61 = vmul.f32 %v1797_v46, %v2454_v48  ;;  %v2511_v19 = vmax.f32 %v519_v8, 0.0  ;;  %v2522_v8 = vmax.f32 %v521_v17, 0.0 }
 0x10a   : > { %v1801_v16 = vpop.eup %1800  ;;  %v592_v21 = vmul.f32 %v1799_v63, %v2459_v50  ;;  %1802 = vrsqrt.f32 %v2509_v14  ;;  %v2535_v17 = vmul.f32 %v433_v58, %v2470_v45  ;;  %vm646_vm8 = vcmp.eq.f32.partialorder %v2509_v14, inf }
 0x10b   : > { %v585_v11 = vmul.f32 %v584_v9, %v2417_v54  ;;  %v605_v26 = vmul.f32 %v1797_v46, %v604_v61  ;;  %v616_v40 = vmul.f32 %v1801_v16, %v2456_v7  ;;  %1804 = vrsqrt.f32 %v2511_v19 }
 0x10c   : > { %v593_v13 = vmul.f32 %v1799_v63, %v592_v21  ;;  %1806 = vrsqrt.f32 %v2522_v8  ;;  %vm648_vm11 = vcmp.eq.f32.partialorder %v2509_v14, 0.0  ;;  %vm634_vm13 = vcmp.eq.f32.partialorder %v2511_v19, inf }
 0x10d   : > { %v587_v44 = vsel %vm586_vm0, %v2417_v54, %v585_v11  ;;  %v606_v36 = vmul.f32 0.5, %v605_v26  ;;  %v617_v35 = vmul.f32 %v1801_v16, %v616_v40  ;;  %v2539_v54 = vmul.f32 128.0, %v2477_v57 }
 0x10e   : > { %v590_v9 = vsel %vm588_vm1, %v589_v42, %v587_v44  ;;  %v594_v61 = vmul.f32 0.5, %v593_v13  ;;  %v2542_v11 = vmul.f32 128.0, %v2497_v49  ;;  %v601_v42 = vand.u32 2147483648, %v2459_v50 }
 0x10f   : > { %v2532_v32 = vadd.f32 1e-06, %v590_v9  ;;  %v607_v28 = vsub.f32 1.5, %v606_v36  ;;  %v618_v29 = vmul.f32 0.5, %v617_v35  ;;  %v613_v35 = vand.u32 2147483648, %v2454_v48 }
 0x110   : > { %v595_v21 = vsub.f32 1.5, %v594_v61  ;;  %v1803_v44 = vpop.eup %1802  ;;  %vm636_vm1 = vcmp.eq.f32.partialorder %v2511_v19, 0.0 }
 0x111   : > { %1808 = vrcp.f32 %v2532_v32  ;;  %v608_v36 = vmul.f32 %v1797_v46, %v607_v28  ;;  %v619_v58 = vsub.f32 1.5, %v618_v29  ;;  %v640_v26 = vmul.f32 %v1803_v44, %v2509_v14  ;;  %v2549_v40 = vpop.eup %1804 }
 0x112   : > { %v596_v59 = vmul.f32 %v1799_v63, %v595_v21  ;;  %v1004_v29 = vand.u32 2147483647, %v2532_v32  ;;  %v625_v46 = vand.u32 2147483648, %v2456_v7  ;;  %v628_v63 = vmul.f32 %v2549_v40, %v2511_v19  ;;  %v2562_v21 = vpop.eup %1806 }
 0x113   : > { %v609_v13 = vmul.f32 %v608_v36, %v2454_v48  ;;  %v620_v61 = vmul.f32 %v1801_v16, %v619_v58  ;;  %v641_v28 = vmul.f32 %v1803_v44, %v640_v26  ;;  %v652_v23 = vmul.f32 %v2562_v21, %v2522_v8 }
 0x114   : > { %v597_v9 = vmul.f32 %v596_v59, %v2459_v50  ;;  %v629_v24 = vmul.f32 %v2549_v40, %v628_v63  ;;  %vm1000_vm9 = vweird.f32 %v2532_v32  ;;  %vm2591_vm10 = vcmp.eq.f32.partialorder %v1004_v29, 8.507059e+37 }
 0x115   : > { %v611_v27 = vsel %vm610_vm2, %v2454_v48, %v609_v13  ;;  %v621_v16 = vmul.f32 %v620_v61, %v2456_v7  ;;  %v642_v59 = vmul.f32 0.5, %v641_v28  ;;  %v1006_v13 = vand.u32 2147483648, %v2532_v32  ;;  %v340_v28 = vpop.xlane.xlu1 %339 }
 0x116   : > { %v599_v36 = vsel %vm598_vm4, %v2459_v50, %v597_v9  ;;  %v614_v26 = vsel %vm612_vm3, %v613_v35, %v611_v27  ;;  %v649_v50 = vand.u32 2147483648, %v2509_v14  ;;  %v630_v63 = vmul.f32 0.5, %v629_v24 }
 0x117   : > { %v1809_v58 = vpop.eup %1808  ;;  %v602_v30 = vsel %vm600_vm5, %v601_v42, %v599_v36  ;;  %v2578_v9 = vadd.f32 1e-06, %v614_v26  ;;  %v623_v27 = vsel %vm622_vm6, %v2456_v7, %v621_v16  ;;  %v643_v48 = vsub.f32 1.5, %v642_v59 }
 0x118   : > { %v996_v45 = vmul.f32 %v1809_v58, %v2532_v32  ;;  %v2580_v61 = vadd.f32 1e-06, %v602_v30  ;;  %v653_v36 = vmul.f32 %v2562_v21, %v652_v23  ;;  %v491_v16 = vsub.f32 %v340_v28, %v2466_v6 }
 0x119   : > { %1810 = vrcp.f32 %v2578_v9  ;;  %vm1001_vm12 = vweird.f32 %v1809_v58  ;;  %v1007_v59 = vor.u32 1.1754944e-38, %v1006_v13  ;;  %v626_v24 = vsel %vm624_vm7, %v625_v46, %v623_v27 }
 0x11a   : > { %v997_v42 = vsub.f32 1.0, %v996_v45  ;;  %1812 = vrcp.f32 %v2580_v61  ;;  %v1032_v23 = vand.u32 2147483647, %v2578_v9  ;;  %v2601_v26 = vadd.f32 1e-06, %v626_v24  ;;  %vm1002_vm14 = vmor %vm1000_vm9, %vm1001_vm12 }
 0x11b   : > { %v644_v29 = vmul.f32 %v1803_v44, %v643_v48  ;;  %v661_v35 = vand.u32 2147483648, %v2522_v8  ;;  %v1034_v15 = vand.u32 2147483648, %v2578_v9  ;;  %v631_v47 = vsub.f32 1.5, %v630_v63 }
 0x11c   : > { %v998_v45 = vmul.f32 %v1809_v58, %v997_v42  ;;  %v654_v6 = vmul.f32 0.5, %v653_v36  ;;  %vm1028_vm15 = vweird.f32 %v2578_v9  ;;  %v1018_v7 = vand.u32 2147483647, %v2580_v61 }
 0x11d   : > { %1814 = vrcp.f32 %v2601_v26  ;;  %v2611_v46 = vmul.f32 0.007874016, %v491_v16  ;;  %vm1014_vm0 = vweird.f32 %v2580_v61  ;;  %v645_v28 = vmul.f32 %v644_v29, %v2509_v14 }
 0x11e   : > { %v999_v25 = vadd.f32 %v1809_v58, %v998_v45  ;;  %v632_v27 = vmul.f32 %v2549_v40, %v631_v47  ;;  %v655_v32 = vsub.f32 1.5, %v654_v6  ;;  %vm658_vm2 = vcmp.eq.f32.partialorder %v2522_v8, inf }
 0x11f   : > { %v1811_v44 = vpop.eup %1810  ;;  %vm2621_vm3 = vcmp.eq.f32.partialorder %v1032_v23, 8.507059e+37  ;;  %v1035_v47 = vor.u32 1.1754944e-38, %v1034_v15  ;;  %vm660_vm5 = vcmp.eq.f32.partialorder %v2522_v8, 0.0  ;;  %v647_v30 = vsel %vm646_vm8, %v2509_v14, %v645_v28 }
 0x120   : > { %v1003_v13 = vsel %vm1002_vm14, %v1809_v58, %v999_v25  ;;  %v1813_v48 = vpop.eup %1812  ;;  %v1024_v63 = vmul.f32 %v1811_v44, %v2578_v9  ;;  %v1020_v25 = vand.u32 2147483648, %v2580_v61  ;;  %vm1029_vm4 = vweird.f32 %v1811_v44 }
 0x121   : > { %v1008_v42 = vsel %vm2591_vm10, %v1007_v59, %v1003_v13  ;;  %v1010_v40 = vmul.f32 %v1813_v48, %v2580_v61  ;;  %v633_v45 = vmul.f32 %v632_v27, %v2511_v19  ;;  %v656_v59 = vmul.f32 %v2562_v21, %v655_v32  ;;  %vm1030_vm8 = vmor %vm1028_vm15, %vm1029_vm4 }
 0x122   : > { %v1445_v58 = vmul.f32 %v2500_v60, %v1008_v42  ;;  %v1025_v16 = vsub.f32 1.0, %v1024_v63  ;;  %vm1015_vm6 = vweird.f32 %v1813_v48  ;;  %v650_v15 = vsel %vm648_vm11, %v649_v50, %v647_v30 }
 0x123   : > { %v1011_v23 = vsub.f32 1.0, %v1010_v40  ;;  %v1815_v29 = vpop.eup %1814  ;;  %v2638_v42 = vadd.f32 1e-06, %v650_v15  ;;  %v657_v63 = vmul.f32 %v656_v59, %v2522_v8  ;;  %vm2646_vm7 = vcmp.eq.f32.partialorder %v1018_v7, 8.507059e+37  ;;  %vm1016_vm9 = vmor %vm1014_vm0, %vm1015_vm6 }
 0x124   : > { %v1478_v24 = vmul.f32 %v1445_v58, %v2393_v34  ;;  %v1543_v6 = vmul.f32 %v1445_v58, %v2180_v2  ;;  %v1026_v13 = vmul.f32 %v1811_v44, %v1025_v16  ;;  %v1038_v21 = vmul.f32 %v1815_v29, %v2601_v26 }
 0x125   : > { %v1012_v27 = vmul.f32 %v1813_v48, %v1011_v23  ;;  %v635_v34 = vsel %vm634_vm13, %v2511_v19, %v633_v45  ;;  %v1021_v2 = vor.u32 1.1754944e-38, %v1020_v25  ;;  %1816 = vrcp.f32 %v2638_v42 }
 0x126   : > { %v1511_v28 = vsub.f32 %v2527_v31, %v1478_v24  ;;  %v1027_v14 = vadd.f32 %v1811_v44, %v1026_v13  ;;  %v1039_v40 = vsub.f32 1.0, %v1038_v21  ;;  %v1046_v16 = vand.u32 2147483647, %v2601_v26  ;;  %v338_v21 = vpop.xlane.xlu0 %337 }
 0x127   : > { %v1013_v58 = vadd.f32 %v1813_v48, %v1012_v27  ;;  %v1048_v7 = vand.u32 2147483648, %v2601_v26  ;;  %v3601_v25 = vand.u32 2147483648, %v2511_v19  ;;  %v659_v9 = vsel %vm658_vm2, %v2522_v8, %v657_v63 }
 0x128   : > { %v1575_v32 = vadd.f32 %v1543_v6, %v1511_v28  ;;  %v1031_v30 = vsel %vm1030_vm8, %v1811_v44, %v1027_v14  ;;  %v1040_v59 = vmul.f32 %v1815_v29, %v1039_v40  ;;  %vm1043_vm10 = vweird.f32 %v1815_v29 }
 0x129   : > { %v638_v45 = vsel %vm636_vm1, %v3601_v25, %v635_v34  ;;  %v1036_v61 = vsel %vm2621_vm3, %v1035_v47, %v1031_v30  ;;  %v1017_v44 = vsel %vm1016_vm9, %v1813_v48, %v1013_v58  ;;  %v662_v15 = vsel %vm660_vm5, %v661_v35, %v659_v9 }
 0x12a   : > { %1607 = vst [vmem:[%s2668_s7] sm:$0xff] %v1575_v32  ;;  %v1447_v24 = vmul.f32 %v2500_v60, %v1036_v61  ;;  %v1022_v19 = vsel %vm2646_vm7, %v1021_v2, %v1017_v44  ;;  %v2676_v23 = vadd.f32 1e-06, %v638_v45  ;;  %v1041_v13 = vadd.f32 %v1815_v29, %v1040_v59  ;;  %v342_v61 = vpop.xlane.xlu2 %341  ;;  %v346_v44 = vpop.xlane.xlu1 %345 }
 0x12b   : > { %v1446_v6 = vmul.f32 %v2500_v60, %v1022_v19  ;;  %vm1042_vm11 = vweird.f32 %v2601_v26  ;;  %vm1047_vm12 = vcmp.eq.f32.partialorder %v1046_v16, 8.507059e+37  ;;  %v1817_v48 = vpop.eup %1816  ;;  %v1049_v47 = vor.u32 1.1754944e-38, %v1048_v7 }
 0x12c   : > { %v1480_v36 = vmul.f32 %v1447_v24, %v2403_v38  ;;  %vm1044_vm13 = vmor %vm1042_vm11, %vm1043_vm10  ;;  %1818 = vrcp.f32 %v2676_v23  ;;  %v2686_v63 = vadd.f32 1e-06, %v662_v15  ;;  %v1066_v8 = vmul.f32 %v1817_v48, %v2638_v42 }
 0x12d   : > { %v1479_v28 = vmul.f32 %v1446_v6, %v2408_v41  ;;  %v1045_v27 = vsel %vm1044_vm13, %v1815_v29, %v1041_v13  ;;  %v1074_v35 = vand.u32 2147483647, %v2638_v42  ;;  %v1545_v34 = vmul.f32 %v1447_v24, %v2177_v1 }
 0x12e   : > { %v1513_v26 = vsub.f32 %v2527_v31, %v1480_v36  ;;  %v1050_v38 = vsel %vm1047_vm12, %v1049_v47, %v1045_v27  ;;  %v2694_v14 = vmax.f32 %v2611_v46, 0.0  ;;  %v1544_v2 = vmul.f32 %v1446_v6, %v2192_v5 }
 0x12f   : > { %v1512_v50 = vsub.f32 %v2527_v31, %v1479_v28  ;;  %v1448_v41 = vmul.f32 %v2500_v60, %v1050_v38  ;;  %v1067_v29 = vsub.f32 1.0, %v1066_v8  ;;  %v1076_v58 = vand.u32 2147483648, %v2638_v42 }
 0x130   : > { %v1577_v32 = vadd.f32 %v1545_v34, %v1513_v26  ;;  %v1060_v40 = vand.u32 2147483647, %v2676_v23  ;;  %1820 = vrcp.f32 %v2686_v63  ;;  %vm1071_vm14 = vweird.f32 %v1817_v48 }
 0x131   : > { %v1576_v1 = vadd.f32 %v1544_v2, %v1512_v50  ;;  %v1481_v16 = vmul.f32 %v1448_v41, %v2405_v39  ;;  %v1068_v46 = vmul.f32 %v1817_v48, %v1067_v29  ;;  %vm1070_vm15 = vweird.f32 %v2638_v42 }
 0x132   : > { %v1819_v30 = vpop.eup %1818  ;;  %1609 = vst [vmem:[%s2668_s7 + $0x10] sm:$0xff] %v1577_v32  ;;  %vm2705_vm0 = vcmp.eq.f32.partialorder %v1074_v35, 8.507059e+37  ;;  %1822 = vrsqrt.f32 %v2694_v14  ;;  %v490_v7 = vsub.f32 %v338_v21, %v2474_v10  ;;  %v1546_v45 = vmul.f32 %v1448_v41, %v2189_v4  ;;  %vm1072_vm1 = vmor %vm1070_vm15, %vm1071_vm14 }
 0x133   : > { %1608 = vst [vmem:[%s2668_s7 + $0x8] sm:$0xff] %v1576_v1  ;;  %v1514_v25 = vsub.f32 %v2527_v31, %v1481_v16  ;;  %v1069_v39 = vadd.f32 %v1817_v48, %v1068_v46  ;;  %v1052_v9 = vmul.f32 %v1819_v30, %v2676_v23  ;;  %v1077_v42 = vor.u32 1.1754944e-38, %v1076_v58 }
 0x134   : > { %vm1056_vm2 = vweird.f32 %v2676_v23  ;;  %vm2716_vm3 = vcmp.eq.f32.partialorder %v1060_v40, 8.507059e+37  ;;  %v1062_v10 = vand.u32 2147483648, %v2676_v23  ;;  %v1088_v4 = vand.u32 2147483647, %v2686_v63 }
 0x135   : > { %v1578_v24 = vadd.f32 %v1546_v45, %v1514_v25  ;;  %v1073_v19 = vsel %vm1072_vm1, %v1817_v48, %v1069_v39  ;;  %v1053_v15 = vsub.f32 1.0, %v1052_v9  ;;  %v522_v36 = vmul.f32 0.007874016, %v490_v7  ;;  %v344_v48 = vpop.xlane.xlu0 %343 }
 0x136   : > { %v1821_v6 = vpop.eup %1820  ;;  %v1078_v13 = vsel %vm2705_vm0, %v1077_v42, %v1073_v19  ;;  %v492_v47 = vsub.f32 %v342_v61, %v2494_v37  ;;  %v494_v28 = vsub.f32 %v346_v44, %v2503_v51  ;;  %vm1057_vm4 = vweird.f32 %v1819_v30  ;;  %v348_v61 = vpop.xlane.xlu2 %347 }
 0x137   : > { %1610 = vst [vmem:[%s2668_s7 + $0x18] sm:$0xff] %v1578_v24  ;;  %v1450_v27 = vmul.f32 %v2500_v60, %v1078_v13  ;;  %v1054_v8 = vmul.f32 %v1819_v30, %v1053_v15  ;;  %v1080_v35 = vmul.f32 %v1821_v6, %v2686_v63  ;;  %v1063_v26 = vor.u32 1.1754944e-38, %v1062_v10  ;;  %vm1058_vm5 = vmor %vm1056_vm2, %vm1057_vm4 }
 0x138   : > { %v1823_v21 = vpop.eup %1822  ;;  %v2729_v34 = vmax.f32 %v522_v36, 0.0  ;;  %v524_v38 = vmul.f32 0.007874016, %v492_v47  ;;  %v526_v50 = vmul.f32 0.007874016, %v494_v28  ;;  %v1090_v51 = vand.u32 2147483648, %v2686_v63 }
 0x139   : > { %v1483_v2 = vmul.f32 %v1450_v27, %v2423_v53  ;;  %v1055_v41 = vadd.f32 %v1819_v30, %v1054_v8  ;;  %v1081_v37 = vsub.f32 1.0, %v1080_v35  ;;  %vm1085_vm6 = vweird.f32 %v1821_v6 }
 0x13a   : > { %v676_v29 = vmul.f32 %v1823_v21, %v2694_v14  ;;  %1824 = vrsqrt.f32 %v2729_v34  ;;  %v493_v32 = vsub.f32 %v344_v48, %v2506_v18  ;;  %v1548_v40 = vmul.f32 %v1450_v27, %v2186_v3 }
 0x13b   : > { %v1516_v58 = vsub.f32 %v2527_v31, %v1483_v2  ;;  %v1059_v53 = vsel %vm1058_vm5, %v1819_v30, %v1055_v41  ;;  %v1082_v1 = vmul.f32 %v1821_v6, %v1081_v37  ;;  %v2742_v23 = vmax.f32 %v524_v38, 0.0 }
 0x13c   : > { %v1064_v16 = vsel %vm2716_vm3, %v1063_v26, %v1059_v53  ;;  %v677_v46 = vmul.f32 %v1823_v21, %v676_v29  ;;  %v2744_v5 = vmax.f32 %v526_v50, 0.0  ;;  %vm1084_vm7 = vweird.f32 %v2686_v63  ;;  %v352_v26 = vpop.xlane.xlu1 %351 }
 0x13d   : > { %v1580_v7 = vadd.f32 %v1548_v40, %v1516_v58  ;;  %v1449_v25 = vmul.f32 %v2500_v60, %v1064_v16  ;;  %v1083_v45 = vadd.f32 %v1821_v6, %v1082_v1  ;;  %vm1086_vm8 = vmor %vm1084_vm7, %vm1085_vm6  ;;  %v1091_v3 = vor.u32 1.1754944e-38, %v1090_v51 }
 0x13e   : > { %v678_v18 = vmul.f32 0.5, %v677_v46  ;;  %1826 = vrsqrt.f32 %v2742_v23  ;;  %v525_v30 = vmul.f32 0.007874016, %v493_v32  ;;  %vm1089_vm9 = vcmp.eq.f32.partialorder %v1088_v4, 8.507059e+37  ;;  %v350_v46 = vpop.xlane.xlu0 %349 }
 0x13f   : > { %1612 = vst [vmem:[%s2668_s7 + $0x28] sm:$0xff] %v1580_v7  ;;  %v1482_v39 = vmul.f32 %v1449_v25, %v2420_v52  ;;  %v1087_v9 = vsel %vm1086_vm8, %v1821_v6, %v1083_v45  ;;  %v436_v44 = vmul.f32 128.0, %v2486_v22  ;;  %1828 = vrsqrt.f32 %v2744_v5 }
 0x140   : > { %v1825_v42 = vpop.eup %1824  ;;  %v1092_v59 = vsel %vm1089_vm9, %v1091_v3, %v1087_v9  ;;  %v679_v10 = vsub.f32 1.5, %v678_v18  ;;  %v2756_v63 = vmul.f32 %v2539_v54, %v2477_v57  ;;  %v1547_v19 = vmul.f32 %v1449_v25, %v2174_v0 }
 0x141   : > { %v1515_v24 = vsub.f32 %v2527_v31, %v1482_v39  ;;  %v1451_v52 = vmul.f32 %v2500_v60, %v1092_v59  ;;  %v664_v15 = vmul.f32 %v1825_v42, %v2729_v34  ;;  %v2762_v6 = vmax.f32 %v525_v30, 0.0 }
 0x142   : > { %v680_v4 = vmul.f32 %v1823_v21, %v679_v10  ;;  %v495_v13 = vsub.f32 %v348_v61, %v2530_v33  ;;  %v2767_v36 = vmul.f32 %v2542_v11, %v2497_v49  ;;  %v2771_v0 = vmul.f32 %v436_v44, %v2486_v22  ;;  %v1922_v11 = vld [vmem:[%s2167_s5 + $0x30] sm:$0xff] }
 0x143   : > { %v1579_v54 = vadd.f32 %v1547_v19, %v1515_v24  ;;  %v1484_v47 = vmul.f32 %v1451_v52, %v2429_v56  ;;  %v665_v28 = vmul.f32 %v1825_v42, %v664_v15  ;;  %vm682_vm10 = vcmp.eq.f32.partialorder %v2694_v14, inf }
 0x144   : > { %v1827_v27 = vpop.eup %1826  ;;  %v681_v8 = vmul.f32 %v680_v4, %v2694_v14  ;;  %v685_v35 = vand.u32 2147483648, %v2694_v14  ;;  %1830 = vrsqrt.f32 %v2762_v6  ;;  %v1549_v48 = vmul.f32 %v1922_v11, %v1451_v52  ;;  %v2812_v52 = vpop.xlane.xlu2 %353 }
 0x145   : > { %1611 = vst [vmem:[%s2668_s7 + $0x20] sm:$0xff] %v1579_v54  ;;  %v1517_v33 = vsub.f32 %v2527_v31, %v1484_v47  ;;  %v666_v21 = vmul.f32 0.5, %v665_v28  ;;  %v688_v56 = vmul.f32 %v1827_v27, %v2742_v23  ;;  %v1829_v38 = vpop.eup %1828  ;;  %vm684_vm11 = vcmp.eq.f32.partialorder %v2694_v14, 0.0 }
 0x146   : > { %v683_v50 = vsel %vm682_vm10, %v2694_v14, %v681_v8  ;;  %v527_v2 = vmul.f32 0.007874016, %v495_v13  ;;  %v2784_v41 = vmul.f32 128.0, %v2489_v12  ;;  %v712_v40 = vmul.f32 %v1829_v38, %v2744_v5 }
 0x147   : > { %v1581_v37 = vadd.f32 %v1549_v48, %v1517_v33  ;;  %v686_v51 = vsel %vm684_vm11, %v685_v35, %v683_v50  ;;  %v667_v29 = vsub.f32 1.5, %v666_v21  ;;  %v689_v32 = vmul.f32 %v1827_v27, %v688_v56 }
 0x148   : > { %v2786_v58 = vadd.f32 1e-06, %v686_v51  ;;  %v2789_v53 = vmax.f32 %v527_v2, 0.0  ;;  %v497_v1 = vsub.f32 %v352_v26, %v2535_v17  ;;  %vm670_vm12 = vcmp.eq.f32.partialorder %v2729_v34, inf }
 0x149   : > { %1613 = vst [vmem:[%s2668_s7 + $0x30] sm:$0xff] %v1581_v37  ;;  %v668_v16 = vmul.f32 %v1825_v42, %v667_v29  ;;  %vm672_vm13 = vcmp.eq.f32.partialorder %v2729_v34, 0.0  ;;  %v690_v14 = vmul.f32 0.5, %v689_v32  ;;  %v673_v25 = vand.u32 2147483648, %v2729_v34 }
 0x14a   : > { %v1831_v7 = vpop.eup %1830  ;;  %1832 = vrcp.f32 %v2786_v58  ;;  %vm694_vm14 = vcmp.eq.f32.partialorder %v2742_v23, inf  ;;  %vm696_vm15 = vcmp.eq.f32.partialorder %v2742_v23, 0.0  ;;  %v713_v3 = vmul.f32 %v1829_v38, %v712_v40 }
 0x14b   : > { %v669_v45 = vmul.f32 %v668_v16, %v2729_v34  ;;  %v691_v17 = vsub.f32 1.5, %v690_v14  ;;  %v700_v18 = vmul.f32 %v1831_v7, %v2762_v6  ;;  %v697_v30 = vand.u32 2147483648, %v2742_v23 }
 0x14c   : > { %1834 = vrsqrt.f32 %v2789_v53  ;;  %v529_v39 = vmul.f32 0.007874016, %v497_v1  ;;  %v496_v9 = vsub.f32 %v350_v46, %v2756_v63  ;;  %v714_v42 = vmul.f32 0.5, %v713_v3 }
 0x14d   : > { %v671_v61 = vsel %vm670_vm12, %v2729_v34, %v669_v45  ;;  %v692_v44 = vmul.f32 %v1827_v27, %v691_v17  ;;  %v701_v59 = vmul.f32 %v1831_v7, %v700_v18  ;;  %v1116_v10 = vand.u32 2147483647, %v2786_v58 }
 0x14e   : > { %v674_v24 = vsel %vm672_vm13, %v673_v25, %v671_v61  ;;  %vm718_vm0 = vcmp.eq.f32.partialorder %v2744_v5, inf  ;;  %v721_v19 = vand.u32 2147483648, %v2744_v5  ;;  %v715_v4 = vsub.f32 1.5, %v714_v42 }
 0x14f   : > { %v2814_v15 = vadd.f32 1e-06, %v674_v24  ;;  %v693_v63 = vmul.f32 %v692_v44, %v2742_v23  ;;  %v702_v13 = vmul.f32 0.5, %v701_v59  ;;  %vm720_vm1 = vcmp.eq.f32.partialorder %v2744_v5, 0.0 }
 0x150   : > { %v1833_v54 = vpop.eup %1832  ;;  %vm706_vm2 = vcmp.eq.f32.partialorder %v2762_v6, inf  ;;  %v709_v34 = vand.u32 2147483648, %v2762_v6  ;;  %v2820_v47 = vmax.f32 %v529_v39, 0.0  ;;  %v528_v28 = vmul.f32 0.007874016, %v496_v9 }
 0x151   : > { %v1108_v27 = vmul.f32 %v1833_v54, %v2786_v58  ;;  %vm1112_vm3 = vweird.f32 %v2786_v58  ;;  %1836 = vrcp.f32 %v2814_v15  ;;  %vm708_vm4 = vcmp.eq.f32.partialorder %v2762_v6, 0.0 }
 0x152   : > { %v498_v8 = vsub.f32 %v2812_v52, %v2767_v36  ;;  %v1835_v35 = vpop.eup %1834  ;;  %vm2828_vm5 = vcmp.eq.f32.partialorder %v1116_v10, 8.507059e+37  ;;  %v1118_v11 = vand.u32 2147483648, %v2786_v58  ;;  %v695_v48 = vsel %vm694_vm14, %v2742_v23, %v693_v63 }
 0x153   : > { %v716_v21 = vmul.f32 %v1829_v38, %v715_v4  ;;  %v1109_v56 = vsub.f32 1.0, %v1108_v27  ;;  %v698_v26 = vsel %vm696_vm15, %v697_v30, %v695_v48  ;;  %v703_v50 = vsub.f32 1.5, %v702_v13 }
 0x154   : > { %v724_v2 = vmul.f32 %v1835_v35, %v2789_v53  ;;  %v1102_v37 = vand.u32 2147483647, %v2814_v15  ;;  %v2840_v51 = vadd.f32 1e-06, %v698_v26  ;;  %1838 = vrsqrt.f32 %v2820_v47 }
 0x155   : > { %v717_v29 = vmul.f32 %v716_v21, %v2744_v5  ;;  %v1110_v32 = vmul.f32 %v1833_v54, %v1109_v56  ;;  %vm1113_vm6 = vweird.f32 %v1833_v54  ;;  %v704_v40 = vmul.f32 %v1831_v7, %v703_v50  ;;  %v1923_v56 = vld [vmem:[%s2167_s5 + $0x40] sm:$0xff] }
 0x156   : > { %v725_v1 = vmul.f32 %v1835_v35, %v724_v2  ;;  %v1119_v38 = vor.u32 1.1754944e-38, %v1118_v11  ;;  %1840 = vrcp.f32 %v2840_v51  ;;  %v733_v23 = vand.u32 2147483648, %v2789_v53  ;;  %vm1114_vm7 = vmor %vm1112_vm3, %vm1113_vm6 }
 0x157   : > { %v757_v16 = vand.u32 2147483648, %v2820_v47  ;;  %v1837_v14 = vpop.eup %1836  ;;  %v1111_v46 = vadd.f32 %v1833_v54, %v1110_v32  ;;  %v719_v25 = vsel %vm718_vm0, %v2744_v5, %v717_v29  ;;  %v705_v45 = vmul.f32 %v704_v40, %v2762_v6 }
 0x158   : > { %v726_v17 = vmul.f32 0.5, %v725_v1  ;;  %v1094_v7 = vmul.f32 %v1837_v14, %v2814_v15  ;;  %vm1098_vm8 = vweird.f32 %v2814_v15  ;;  %vm2855_vm9 = vcmp.eq.f32.partialorder %v1102_v37, 8.507059e+37 }
 0x159   : > { %v1104_v18 = vand.u32 2147483648, %v2814_v15  ;;  %v1115_v30 = vsel %vm1114_vm7, %v1833_v54, %v1111_v46  ;;  %v722_v39 = vsel %vm720_vm1, %v721_v19, %v719_v25  ;;  %v707_v9 = vsel %vm706_vm2, %v2762_v6, %v705_v45  ;;  %v358_v45 = vpop.xlane.xlu1 %357 }
 0x15a   : > { %v727_v58 = vsub.f32 1.5, %v726_v17  ;;  %vm730_vm10 = vcmp.eq.f32.partialorder %v2789_v53, inf  ;;  %v2866_v61 = vpop.eup %1838  ;;  %v1120_v44 = vsel %vm2828_vm5, %v1119_v38, %v1115_v30  ;;  %v1095_v42 = vsub.f32 1.0, %v1094_v7 }
 0x15b   : > { %v2870_v59 = vadd.f32 1e-06, %v722_v39  ;;  %v710_v10 = vsel %vm708_vm4, %v709_v34, %v707_v9  ;;  %vm732_vm11 = vcmp.eq.f32.partialorder %v2789_v53, 0.0  ;;  %v1453_v5 = vmul.f32 %v2500_v60, %v1120_v44 }
 0x15c   : > { %v1130_v24 = vand.u32 2147483647, %v2840_v51  ;;  %v1132_v19 = vand.u32 2147483648, %v2840_v51  ;;  %v2878_v63 = vadd.f32 1e-06, %v710_v10  ;;  %v1841_v4 = vpop.eup %1840  ;;  %v1096_v13 = vmul.f32 %v1837_v14, %v1095_v42 }
 0x15d   : > { %vm1099_vm12 = vweird.f32 %v1837_v14  ;;  %1842 = vrcp.f32 %v2870_v59  ;;  %v728_v54 = vmul.f32 %v1835_v35, %v727_v58  ;;  %v1486_v6 = vmul.f32 %v1453_v5, %v2426_v55 }
 0x15e   : > { %v1105_v34 = vor.u32 1.1754944e-38, %v1104_v18  ;;  %v1122_v27 = vmul.f32 %v1841_v4, %v2840_v51  ;;  %v2883_v33 = vmax.f32 %v528_v28, 0.0  ;;  %v1097_v11 = vadd.f32 %v1837_v14, %v1096_v13  ;;  %vm1100_vm14 = vmor %vm1098_vm8, %vm1099_vm12 }
 0x15f   : > { %vm1126_vm13 = vweird.f32 %v2840_v51  ;;  %1844 = vrcp.f32 %v2878_v63  ;;  %v748_v48 = vmul.f32 %v2866_v61, %v2820_v47  ;;  %v1519_v21 = vsub.f32 %v2527_v31, %v1486_v6 }
 0x160   : > { %v1551_v26 = vmul.f32 %v1923_v56, %v1453_v5  ;;  %v1123_v55 = vsub.f32 1.0, %v1122_v27  ;;  %v1158_v28 = vand.u32 2147483647, %v2870_v59  ;;  %v1101_v35 = vsel %vm1100_vm14, %v1837_v14, %v1097_v11  ;;  %v1925_v56 = vld [vmem:[%s2167_s5 + $0x48] sm:$0xff] }
 0x161   : > { %vm2894_vm15 = vcmp.eq.f32.partialorder %v1130_v24, 8.507059e+37  ;;  %v1133_v2 = vor.u32 1.1754944e-38, %v1132_v19  ;;  %v729_v37 = vmul.f32 %v728_v54, %v2789_v53  ;;  %v1106_v32 = vsel %vm2855_vm9, %v1105_v34, %v1101_v35 }
 0x162   : > { %v1583_v29 = vadd.f32 %v1551_v26, %v1519_v21  ;;  %v1124_v40 = vmul.f32 %v1841_v4, %v1123_v55  ;;  %vm1127_vm0 = vweird.f32 %v1841_v4  ;;  %v1452_v1 = vmul.f32 %v2500_v60, %v1106_v32 }
 0x163   : > { %v1843_v15 = vpop.eup %1842  ;;  %vm1154_vm1 = vweird.f32 %v2870_v59  ;;  %v731_v38 = vsel %vm730_vm10, %v2789_v53, %v729_v37  ;;  %v749_v14 = vmul.f32 %v2866_v61, %v748_v48  ;;  %vm2909_vm2 = vcmp.eq.f32.partialorder %v1158_v28, 8.507059e+37  ;;  %vm1128_vm3 = vmor %vm1126_vm13, %vm1127_vm0 }
 0x164   : > { %1615 = vst [vmem:[%s2668_s7 + $0x40] sm:$0xff] %v1583_v29  ;;  %v1125_v46 = vadd.f32 %v1841_v4, %v1124_v40  ;;  %v1150_v25 = vmul.f32 %v1843_v15, %v2870_v59  ;;  %v734_v17 = vsel %vm732_vm11, %v733_v23, %v731_v38  ;;  %v1485_v3 = vmul.f32 %v1452_v1, %v2435_v62  ;;  %v1924_v23 = vld [vmem:[%s2167_s5 + $0x38] sm:$0xff] }
 0x165   : > { %v1845_v7 = vpop.eup %1844  ;;  %v1160_v18 = vand.u32 2147483648, %v2870_v59  ;;  %v2921_v30 = vadd.f32 1e-06, %v734_v17  ;;  %v750_v39 = vmul.f32 0.5, %v749_v14  ;;  %v1144_v42 = vand.u32 2147483647, %v2878_v63 }
 0x166   : > { %v1129_v9 = vsel %vm1128_vm3, %v1841_v4, %v1125_v46  ;;  %v1151_v58 = vsub.f32 1.0, %v1150_v25  ;;  %v1136_v44 = vmul.f32 %v1845_v7, %v2878_v63  ;;  %vm754_vm4 = vcmp.eq.f32.partialorder %v2820_v47, inf }
 0x167   : > { %v1518_v53 = vsub.f32 %v2527_v31, %v1485_v3  ;;  %v1550_v62 = vmul.f32 %v1924_v23, %v1452_v1  ;;  %v1134_v51 = vsel %vm2894_vm15, %v1133_v2, %v1129_v9  ;;  %1846 = vrcp.f32 %v2921_v30  ;;  %v3616_v3 = vld [vmem:[#allocation24_spill] sm:$0xff] }
 0x168   : > { %v1454_v10 = vmul.f32 %v2500_v60, %v1134_v51  ;;  %v1152_v5 = vmul.f32 %v1843_v15, %v1151_v58  ;;  %vm1155_vm5 = vweird.f32 %v1843_v15  ;;  %v1137_v24 = vsub.f32 1.0, %v1136_v44  ;;  %v1927_v9 = vld [vmem:[%s2167_s5 + $0x50] sm:$0xff] }
 0x169   : > { %vm756_vm6 = vcmp.eq.f32.partialorder %v2820_v47, 0.0  ;;  %v1582_v19 = vadd.f32 %v1550_v62, %v1518_v53  ;;  %v1146_v4 = vand.u32 2147483648, %v2878_v63  ;;  %v751_v13 = vsub.f32 1.5, %v750_v39  ;;  %vm1156_vm8 = vmor %vm1154_vm1, %vm1155_vm5  ;;  %v356_v62 = vpop.xlane.xlu0 %355 }
 0x16a   : > { %1848 = vrsqrt.f32 %v2883_v33  ;;  %v1487_v54 = vmul.f32 %v1454_v10, %v2442_v20  ;;  %v1153_v6 = vadd.f32 %v1843_v15, %v1152_v5  ;;  %v1138_v34 = vmul.f32 %v1845_v7, %v1137_v24 }
 0x16b   : > { %vm1141_vm7 = vweird.f32 %v1845_v7  ;;  %1614 = vst [vmem:[%s2668_s7 + $0x38] sm:$0xff] %v1582_v19  ;;  %v1161_v27 = vor.u32 1.1754944e-38, %v1160_v18  ;;  %vm1140_vm9 = vweird.f32 %v2878_v63  ;;  %vm2940_vm10 = vcmp.eq.f32.partialorder %v1144_v42, 8.507059e+37 }
 0x16c   : > { %v752_v48 = vmul.f32 %v2866_v61, %v751_v13  ;;  %v1520_v21 = vsub.f32 %v2527_v31, %v1487_v54  ;;  %v1552_v20 = vmul.f32 %v1925_v56, %v1454_v10  ;;  %v1157_v26 = vsel %vm1156_vm8, %v1843_v15, %v1153_v6  ;;  %vm1142_vm11 = vmor %vm1140_vm9, %vm1141_vm7 }
 0x16d   : > { %v1139_v55 = vadd.f32 %v1845_v7, %v1138_v34  ;;  %v1847_v28 = vpop.eup %1846  ;;  %v1162_v59 = vsel %vm2909_vm2, %v1161_v27, %v1157_v26  ;;  %v1147_v35 = vor.u32 1.1754944e-38, %v1146_v4  ;;  %v530_v50 = vmul.f32 0.007874016, %v498_v8 }
 0x16e   : > { %v753_v63 = vmul.f32 %v752_v48, %v2820_v47  ;;  %v1584_v61 = vadd.f32 %v1552_v20, %v1520_v21  ;;  %v1456_v2 = vmul.f32 %v2500_v60, %v1162_v59  ;;  %v1164_v29 = vmul.f32 %v1847_v28, %v2921_v30  ;;  %v3617_v48 = vld [vmem:[#allocation26_spill] sm:$0xff] }
 0x16f   : > { %v1143_v37 = vsel %vm1142_vm11, %v1845_v7, %v1139_v55  ;;  %v1172_v15 = vand.u32 2147483647, %v2921_v30  ;;  %v2961_v38 = vmax.f32 %v530_v50, 0.0  ;;  %v1174_v14 = vand.u32 2147483648, %v2921_v30  ;;  %v1926_v7 = vld [vmem:[%s2167_s5 + $0x58] sm:$0xff]  ;;  %v1928_v55 = vld [vmem:[%s2167_s5 + $0x60] sm:$0xff] }
 0x170   : > { %v1849_v32 = vpop.eup %1848  ;;  %v1148_v40 = vsel %vm2940_vm10, %v1147_v35, %v1143_v37  ;;  %v755_v1 = vsel %vm754_vm4, %v2820_v47, %v753_v63  ;;  %1616 = vst [vmem:[%s2668_s7 + $0x48] sm:$0xff] %v1584_v61  ;;  %v1489_v36 = vmul.f32 %v1456_v2, %v2447_v43  ;;  %v1165_v8 = vsub.f32 1.0, %v1164_v29 }
 0x171   : > { %v1455_v52 = vmul.f32 %v2500_v60, %v1148_v40  ;;  %vm1169_vm12 = vweird.f32 %v1847_v28  ;;  %v758_v46 = vsel %vm756_vm6, %v757_v16, %v755_v1  ;;  %v736_v25 = vmul.f32 %v1849_v32, %v2883_v33 }
 0x172   : > { %1850 = vrsqrt.f32 %v2961_v38  ;;  %v1522_v17 = vsub.f32 %v2527_v31, %v1489_v36  ;;  %v1554_v43 = vmul.f32 %v1926_v7, %v1456_v2  ;;  %v1166_v39 = vmul.f32 %v1847_v28, %v1165_v8 }
 0x173   : > { %v1488_v18 = vmul.f32 %v1455_v52, %v3616_v3  ;;  %v1553_v58 = vmul.f32 %v1927_v9, %v1455_v52  ;;  %vm1168_vm13 = vweird.f32 %v2921_v30  ;;  %v2978_v44 = vadd.f32 1e-06, %v758_v46 }
 0x174   : > { %v737_v47 = vmul.f32 %v1849_v32, %v736_v25  ;;  %v1586_v16 = vadd.f32 %v1554_v43, %v1522_v17  ;;  %v1167_v53 = vadd.f32 %v1847_v28, %v1166_v39  ;;  %v500_v23 = vsub.f32 %v358_v45, %v2771_v0  ;;  %vm1170_vm14 = vmor %vm1168_vm13, %vm1169_vm12  ;;  %v3618_v25 = vld [vmem:[#allocation12_spill] sm:$0xff] }
 0x175   : > { %v1521_v42 = vsub.f32 %v2527_v31, %v1488_v18  ;;  %vm1173_vm15 = vcmp.eq.f32.partialorder %v1172_v15, 8.507059e+37  ;;  %v1175_v51 = vor.u32 1.1754944e-38, %v1174_v14  ;;  %1852 = vrcp.f32 %v2978_v44 }
 0x176   : > { %v467_v30 = vmul.f32 %v2784_v41, %v2489_v12  ;;  %1618 = vst [vmem:[%s2668_s7 + $0x58] sm:$0xff] %v1586_v16  ;;  %v1171_v5 = vsel %vm1170_vm14, %v1847_v28, %v1167_v53  ;;  %v738_v24 = vmul.f32 0.5, %v737_v47  ;;  %v532_v19 = vmul.f32 0.007874016, %v500_v23 }
 0x177   : > { %v1585_v10 = vadd.f32 %v1553_v58, %v1521_v42  ;;  %v1176_v13 = vsel %vm1173_vm15, %v1175_v51, %v1171_v5  ;;  %vm742_vm0 = vcmp.eq.f32.partialorder %v2883_v33, inf  ;;  %v745_v63 = vand.u32 2147483648, %v2883_v33 }
 0x178   : > { %v1851_v4 = vpop.eup %1850  ;;  %v499_v54 = vsub.f32 %v356_v62, %v467_v30  ;;  %v1457_v0 = vmul.f32 %v2500_v60, %v1176_v13  ;;  %v739_v6 = vsub.f32 1.5, %v738_v24  ;;  %v2990_v27 = vmax.f32 %v532_v19, 0.0  ;;  %v3619_v62 = vld [vmem:[#allocation25_spill] sm:$0xff]  ;;  %v1929_v24 = vld [vmem:[%s2167_s5 + $0x70] sm:$0xff] }
 0x179   : > { %1617 = vst [vmem:[%s2668_s7 + $0x50] sm:$0xff] %v1585_v10  ;;  %v760_v34 = vmul.f32 %v1851_v4, %v2961_v38  ;;  %vm744_vm1 = vcmp.eq.f32.partialorder %v2883_v33, 0.0  ;;  %v1200_v36 = vand.u32 2147483647, %v2978_v44  ;;  %vm1196_vm3 = vweird.f32 %v2978_v44 }
 0x17a   : > { %v531_v11 = vmul.f32 0.007874016, %v499_v54  ;;  %v1490_v41 = vmul.f32 %v1457_v0, %v3617_v48  ;;  %v740_v21 = vmul.f32 %v1849_v32, %v739_v6  ;;  %1854 = vrsqrt.f32 %v2990_v27 }
 0x17b   : > { %v761_v56 = vmul.f32 %v1851_v4, %v760_v34  ;;  %v1853_v20 = vpop.eup %1852  ;;  %v1555_v28 = vmul.f32 %v1928_v55, %v1457_v0  ;;  %v1202_v32 = vand.u32 2147483648, %v2978_v44  ;;  %vm1201_vm5 = vcmp.eq.f32.partialorder %v1200_v36, 8.507059e+37 }
 0x17c   : > { %v1523_v26 = vsub.f32 %v2527_v31, %v1490_v41  ;;  %v1192_v59 = vmul.f32 %v1853_v20, %v2978_v44  ;;  %v741_v35 = vmul.f32 %v740_v21, %v2883_v33  ;;  %v3000_v61 = vmax.f32 %v531_v11, 0.0 }
 0x17d   : > { %v762_v50 = vmul.f32 0.5, %v761_v56  ;;  %vm1197_vm2 = vweird.f32 %v1853_v20  ;;  %v1203_v45 = vor.u32 1.1754944e-38, %v1202_v32  ;;  %vm766_vm6 = vcmp.eq.f32.partialorder %v2961_v38, inf }
 0x17e   : > { %v1587_v2 = vadd.f32 %v1555_v28, %v1523_v26  ;;  %v1193_v37 = vsub.f32 1.0, %v1192_v59  ;;  %v743_v29 = vsel %vm742_vm0, %v2883_v33, %v741_v35  ;;  %1856 = vrsqrt.f32 %v3000_v61  ;;  %vm1198_vm4 = vmor %vm1196_vm3, %vm1197_vm2 }
 0x17f   : > { %v746_v40 = vsel %vm744_vm1, %v745_v63, %v743_v29  ;;  %v763_v15 = vsub.f32 1.5, %v762_v50  ;;  %v3010_v33 = vmul.f32 0.0078125, %v3618_v25  ;;  %v769_v3 = vand.u32 2147483648, %v2961_v38  ;;  %v360_v29 = vpop.xlane.xlu2 %359 }
 0x180   : > { %1619 = vst [vmem:[%s2668_s7 + $0x60] sm:$0xff] %v1587_v2  ;;  %v1194_v1 = vmul.f32 %v1853_v20, %v1193_v37  ;;  %v976_v52 = vadd.f32 1e-06, %v746_v40  ;;  %v1855_v8 = vpop.eup %1854  ;;  %vm768_vm7 = vcmp.eq.f32.partialorder %v2961_v38, 0.0  ;;  %vm790_vm9 = vcmp.eq.f32.partialorder %v2990_v27, inf }
 0x181   : > { %v764_v14 = vmul.f32 %v1851_v4, %v763_v15  ;;  %v784_v7 = vmul.f32 %v1855_v8, %v2990_v27  ;;  %v437_v10 = vmul.f32 128.0, %v3010_v33  ;;  %vm792_vm10 = vcmp.eq.f32.partialorder %v2990_v27, 0.0 }
 0x182   : > { %v1195_v46 = vadd.f32 %v1853_v20, %v1194_v1  ;;  %1858 = vrcp.f32 %v976_v52  ;;  %v1188_v6 = vand.u32 2147483648, %v976_v52  ;;  %v1186_v41 = vand.u32 2147483647, %v976_v52 }
 0x183   : > { %v765_v17 = vmul.f32 %v764_v14, %v2961_v38  ;;  %v785_v58 = vmul.f32 %v1855_v8, %v784_v7  ;;  %v469_v11 = vmul.f32 %v437_v10, %v3010_v33  ;;  %vm1182_vm11 = vweird.f32 %v976_v52 }
 0x184   : > { %v1199_v43 = vsel %vm1198_vm4, %v1853_v20, %v1195_v46  ;;  %v1857_v18 = vpop.eup %1856  ;;  %v793_v20 = vand.u32 2147483648, %v2990_v27  ;;  %vm778_vm12 = vcmp.eq.f32.partialorder %v3000_v61, inf  ;;  %v1189_v59 = vor.u32 1.1754944e-38, %v1188_v6 }
 0x185   : > { %v1204_v39 = vsel %vm1201_vm5, %v1203_v45, %v1199_v43  ;;  %v767_v9 = vsel %vm766_vm6, %v2961_v38, %v765_v17  ;;  %v772_v16 = vmul.f32 %v1857_v18, %v3000_v61  ;;  %v786_v53 = vmul.f32 0.5, %v785_v58 }
 0x186   : > { %v1459_v44 = vmul.f32 %v2500_v60, %v1204_v39  ;;  %v770_v47 = vsel %vm768_vm7, %v769_v3, %v767_v9  ;;  %vm780_vm14 = vcmp.eq.f32.partialorder %v3000_v61, 0.0  ;;  %vm1187_vm15 = vcmp.eq.f32.partialorder %v1186_v41, 8.507059e+37 }
 0x187   : > { %v3020_v42 = vadd.f32 1e-06, %v770_v47  ;;  %v773_v30 = vmul.f32 %v1857_v18, %v772_v16  ;;  %v787_v4 = vsub.f32 1.5, %v786_v53  ;;  %v501_v1 = vsub.f32 %v360_v29, %v469_v11 }
 0x188   : > { %v1859_v23 = vpop.eup %1858  ;;  %v1492_v51 = vmul.f32 %v1459_v44, %v3619_v62  ;;  %v1557_v19 = vmul.f32 %v1929_v24, %v1459_v44 }
 0x189   : > { %v1178_v5 = vmul.f32 %v1859_v23, %v976_v52  ;;  %1860 = vrcp.f32 %v3020_v42  ;;  %v774_v54 = vmul.f32 0.5, %v773_v30  ;;  %v788_v34 = vmul.f32 %v1855_v8, %v787_v4  ;;  %v1931_v30 = vld [vmem:[%s2167_s5 + $0x78] sm:$0xff]  ;;  %v3620_v4 = vld [vmem:[#allocation10_spill] sm:$0xff] }
 0x18a   : > { %v1525_v38 = vsub.f32 %v2527_v31, %v1492_v51  ;;  %vm1183_vm8 = vweird.f32 %v1859_v23  ;;  %v1216_v52 = vand.u32 2147483648, %v3020_v42  ;;  %v781_v8 = vand.u32 2147483648, %v3000_v61 }
 0x18b   : > { %v1179_v13 = vsub.f32 1.0, %v1178_v5  ;;  %v775_v21 = vsub.f32 1.5, %v774_v54  ;;  %v789_v56 = vmul.f32 %v788_v34, %v2990_v27  ;;  %vm1184_vm13 = vmor %vm1182_vm11, %vm1183_vm8  ;;  %v1214_v46 = vand.u32 2147483647, %v3020_v42  ;;  %v3621_v54 = vld [vmem:[#allocation11_spill] sm:$0xff] }
 0x18c   : > { %v1589_v0 = vadd.f32 %v1557_v19, %v1525_v38  ;;  %vm1210_vm1 = vweird.f32 %v3020_v42  ;;  %v533_v43 = vmul.f32 0.007874016, %v501_v1  ;;  %v1217_v9 = vor.u32 1.1754944e-38, %v1216_v52  ;;  %v3622_v34 = vld [vmem:[#allocation15_spill] sm:$0xff] }
 0x18d   : > { %v1180_v48 = vmul.f32 %v1859_v23, %v1179_v13  ;;  %v776_v28 = vmul.f32 %v1857_v18, %v775_v21  ;;  %v791_v63 = vsel %vm790_vm9, %v2990_v27, %v789_v56  ;;  %v1930_v18 = vld [vmem:[%s2167_s5 + $0x68] sm:$0xff]  ;;  %vm1215_vm3 = vcmp.eq.f32.partialorder %v1214_v46, 8.507059e+37 }
 0x18e   : > { %1621 = vst [vmem:[%s2668_s7 + $0x70] sm:$0xff] %v1589_v0  ;;  %v794_v2 = vsel %vm792_vm10, %v793_v20, %v791_v63  ;;  %v3060_v13 = vmul.f32 0.0078125, %v3620_v4  ;;  %v3063_v0 = vmul.f32 0.0078125, %v3621_v54  ;;  %v3066_v11 = vmul.f32 0.0078125, %v3622_v34  ;;  %v3628_v4 = vld [vmem:[#allocation21_spill] sm:$0xff] }
 0x18f   : > { %v1861_v26 = vpop.eup %1860  ;;  %v1181_v55 = vadd.f32 %v1859_v23, %v1180_v48  ;;  %v777_v37 = vmul.f32 %v776_v28, %v3000_v61  ;;  %v980_v15 = vadd.f32 1e-06, %v794_v2  ;;  %v3104_v54 = vmul.f32 0.0078125, %v3628_v4 }
 0x190   : > { %v1206_v35 = vmul.f32 %v1861_v26, %v3020_v42  ;;  %vm1211_vm0 = vweird.f32 %v1861_v26  ;;  %v439_v29 = vmul.f32 128.0, %v3060_v13  ;;  %v440_v1 = vmul.f32 128.0, %v3066_v11 }
 0x191   : > { %v1185_v50 = vsel %vm1184_vm13, %v1859_v23, %v1181_v55  ;;  %v779_v27 = vsel %vm778_vm12, %v3000_v61, %v777_v37  ;;  %1862 = vrcp.f32 %v980_v15  ;;  %vm1212_vm2 = vmor %vm1210_vm1, %vm1211_vm0  ;;  %v3051_v61 = vmax.f32 %v533_v43, 0.0 }
 0x192   : > { %v1190_v32 = vsel %vm1187_vm15, %v1189_v59, %v1185_v50  ;;  %v1207_v40 = vsub.f32 1.0, %v1206_v35  ;;  %v782_v45 = vsel %vm780_vm14, %v781_v8, %v779_v27  ;;  %v1242_v5 = vand.u32 2147483647, %v980_v15  ;;  %v3624_v27 = vld [vmem:[#allocation14_spill] sm:$0xff] }
 0x193   : > { %v1458_v36 = vmul.f32 %v2500_v60, %v1190_v32  ;;  %v979_v7 = vadd.f32 1e-06, %v782_v45  ;;  %v1244_v38 = vand.u32 2147483648, %v980_v15  ;;  %vm1238_vm5 = vweird.f32 %v980_v15 }
 0x194   : > { %v1208_v14 = vmul.f32 %v1861_v26, %v1207_v40  ;;  %vm1243_vm7 = vcmp.eq.f32.partialorder %v1242_v5, 8.507059e+37  ;;  %v438_v32 = vmul.f32 128.0, %v3063_v0  ;;  %v3079_v8 = vmul.f32 0.0078125, %v3624_v27  ;;  %v3631_v27 = vld [vmem:[#allocation23_spill] sm:$0xff] }
 0x195   : > { %v1491_v25 = vmul.f32 %v1458_v36, %v2477_v57  ;;  %v1556_v39 = vmul.f32 %v1930_v18, %v1458_v36  ;;  %1864 = vrcp.f32 %v979_v7  ;;  %v1245_v21 = vor.u32 1.1754944e-38, %v1244_v38  ;;  %v3623_v36 = vld [vmem:[#allocation13_spill] sm:$0xff]  ;;  %v1933_v38 = vld [vmem:[%s2167_s5 + $0x80] sm:$0xff] }
 0x196   : > { %v1209_v17 = vadd.f32 %v1861_v26, %v1208_v14  ;;  %1866 = vrsqrt.f32 %v3051_v61  ;;  %v1230_v56 = vand.u32 2147483648, %v979_v7  ;;  %v1228_v28 = vand.u32 2147483647, %v979_v7 }
 0x197   : > { %v1524_v3 = vsub.f32 %v2527_v31, %v1491_v25  ;;  %v1863_v47 = vpop.eup %1862  ;;  %vm1224_vm9 = vweird.f32 %v979_v7  ;;  %v3076_v52 = vmul.f32 0.0078125, %v3623_v36  ;;  %v3625_v25 = vld [vmem:[#allocation16_spill] sm:$0xff]  ;;  %vm802_vm12 = vcmp.eq.f32.partialorder %v3051_v61, inf }
 0x198   : > { %v1213_v58 = vsel %vm1212_vm2, %v1861_v26, %v1209_v17  ;;  %v1234_v42 = vmul.f32 %v1863_v47, %v980_v15  ;;  %vm1239_vm4 = vweird.f32 %v1863_v47  ;;  %v1231_v2 = vor.u32 1.1754944e-38, %v1230_v56 }
 0x199   : > { %v1588_v57 = vadd.f32 %v1556_v39, %v1524_v3  ;;  %v1218_v44 = vsel %vm1215_vm3, %v1217_v9, %v1213_v58  ;;  %vm1240_vm6 = vmor %vm1238_vm5, %vm1239_vm4  ;;  %vm1229_vm11 = vcmp.eq.f32.partialorder %v1228_v28, 8.507059e+37  ;;  %v3082_v45 = vmul.f32 0.0078125, %v3625_v25  ;;  %v3626_v3 = vld [vmem:[#allocation17_spill] sm:$0xff]  ;;  %v3627_v39 = vld [vmem:[#allocation18_spill] sm:$0xff] }
 0x19a   : > { %v1460_v16 = vmul.f32 %v2500_v60, %v1218_v44  ;;  %v1235_v23 = vsub.f32 1.0, %v1234_v42  ;;  %v3088_v18 = vmul.f32 0.0078125, %v3626_v3  ;;  %v3091_v9 = vmul.f32 0.0078125, %v3627_v39 }
 0x19b   : > { %1620 = vst [vmem:[%s2668_s7 + $0x68] sm:$0xff] %v1588_v57  ;;  %v1865_v62 = vpop.eup %1864  ;;  %v471_v57 = vmul.f32 %v439_v29, %v3060_v13  ;;  %v470_v42 = vmul.f32 %v438_v32, %v3063_v0  ;;  %vm804_vm13 = vcmp.eq.f32.partialorder %v3051_v61, 0.0  ;;  %v446_v32 = vmul.f32 128.0, %v3104_v54 }
 0x19c   : > { %v1493_v53 = vmul.f32 %v1460_v16, %v2497_v49  ;;  %v1558_v10 = vmul.f32 %v1931_v30, %v1460_v16  ;;  %v1236_v24 = vmul.f32 %v1863_v47, %v1235_v23  ;;  %v1220_v19 = vmul.f32 %v1865_v62, %v979_v7  ;;  %v1867_v49 = vpop.eup %1866  ;;  %v1932_v7 = vld [vmem:[%s2167_s5 + $0x88] sm:$0xff]  ;;  %v364_v16 = vpop.xlane.xlu1 %363 }
 0x19d   : > { %v796_v20 = vmul.f32 %v1867_v49, %v3051_v61  ;;  %vm1225_vm8 = vweird.f32 %v1865_v62  ;;  %v362_v30 = vpop.xlane.xlu0 %361 }
 0x19e   : > { %v1526_v51 = vsub.f32 %v2527_v31, %v1493_v53  ;;  %v1237_v48 = vadd.f32 %v1863_v47, %v1236_v24  ;;  %v1221_v41 = vsub.f32 1.0, %v1220_v19  ;;  %vm1226_vm10 = vmor %vm1224_vm9, %vm1225_vm8  ;;  %v472_v53 = vmul.f32 %v440_v1, %v3066_v11  ;;  %v3630_v1 = vld [vmem:[#allocation20_spill] sm:$0xff] }
 0x19f   : > { %v797_v35 = vmul.f32 %v1867_v49, %v796_v20  ;;  %v502_v24 = vsub.f32 %v362_v30, %v470_v42  ;;  %v3132_v36 = vmul.f32 0.0078125, %v3630_v1 }
 0x1a0   : > { %v1590_v6 = vadd.f32 %v1558_v10, %v1526_v51  ;;  %v1241_v26 = vsel %vm1240_vm6, %v1863_v47, %v1237_v48  ;;  %v1222_v55 = vmul.f32 %v1865_v62, %v1221_v41  ;;  %v503_v51 = vsub.f32 %v364_v16, %v471_v57  ;;  %v366_v10 = vpop.xlane.xlu2 %365 }
 0x1a1   : > { %v1246_v59 = vsel %vm1243_vm7, %v1245_v21, %v1241_v26  ;;  %v798_v37 = vmul.f32 0.5, %v797_v35  ;;  %v504_v19 = vsub.f32 %v366_v10, %v472_v53  ;;  %v534_v41 = vmul.f32 0.007874016, %v502_v24 }
 0x1a2   : > { %1622 = vst [vmem:[%s2668_s7 + $0x78] sm:$0xff] %v1590_v6  ;;  %v1462_v63 = vmul.f32 %v2500_v60, %v1246_v59  ;;  %v1223_v50 = vadd.f32 %v1865_v62, %v1222_v55  ;;  %v442_v26 = vmul.f32 128.0, %v3076_v52  ;;  %v441_v55 = vmul.f32 128.0, %v3079_v8 }
 0x1a3   : > { %v799_v46 = vsub.f32 1.5, %v798_v37  ;;  %v536_v21 = vmul.f32 0.007874016, %v504_v19  ;;  %v3115_v28 = vmax.f32 %v534_v41, 0.0  ;;  %v445_v35 = vmul.f32 128.0, %v3082_v45 }
 0x1a4   : > { %v1495_v40 = vmul.f32 %v1462_v63, %v2486_v22  ;;  %v1227_v15 = vsel %vm1226_vm10, %v1865_v62, %v1223_v50  ;;  %v1560_v43 = vmul.f32 %v1932_v7, %v1462_v63  ;;  %v805_v62 = vand.u32 2147483648, %v3051_v61 }
 0x1a5   : > { %v1232_v14 = vsel %vm1229_vm11, %v1231_v2, %v1227_v15  ;;  %v800_v58 = vmul.f32 %v1867_v49, %v799_v46  ;;  %v535_v49 = vmul.f32 0.007874016, %v503_v51  ;;  %v3117_v59 = vmax.f32 %v536_v21, 0.0  ;;  %v370_v2 = vpop.xlane.xlu1 %369  ;;  %v368_v29 = vpop.xlane.xlu0 %367 }
 0x1a6   : > { %v1528_v17 = vsub.f32 %v2527_v31, %v1495_v40  ;;  %v1461_v22 = vmul.f32 %v2500_v60, %v1232_v14  ;;  %v444_v63 = vmul.f32 128.0, %v3088_v18  ;;  %v474_v50 = vmul.f32 %v442_v26, %v3076_v52  ;;  %v3629_v40 = vld [vmem:[#allocation19_spill] sm:$0xff] }
 0x1a7   : > { %v801_v23 = vmul.f32 %v800_v58, %v3051_v61  ;;  %v3110_v20 = vmax.f32 %v535_v49, 0.0  ;;  %v473_v37 = vmul.f32 %v441_v55, %v3079_v8  ;;  %v3129_v15 = vmul.f32 0.0078125, %v3629_v40 }
 0x1a8   : > { %v1592_v44 = vadd.f32 %v1560_v43, %v1528_v17  ;;  %v1494_v47 = vmul.f32 %v1461_v22, %v2489_v12  ;;  %v1559_v12 = vmul.f32 %v1933_v38, %v1461_v22  ;;  %v3135_v14 = vmul.f32 0.0078125, %v3631_v27  ;;  %v372_v46 = vpop.xlane.xlu2 %371  ;;  %v3632_v43 = vld [vmem:[#allocation22_spill] sm:$0xff] }
 0x1a9   : > { %v803_v6 = vsel %vm802_vm12, %v3051_v61, %v801_v23  ;;  %v443_v61 = vmul.f32 128.0, %v3091_v9  ;;  %v506_v25 = vsub.f32 %v370_v2, %v474_v50  ;;  %v505_v17 = vsub.f32 %v368_v29, %v473_v37 }
 0x1aa   : > { %1624 = vst [vmem:[%s2668_s7 + $0x88] sm:$0xff] %v1592_v44  ;;  %v1527_v5 = vsub.f32 %v2527_v31, %v1494_v47  ;;  %v806_v48 = vsel %vm804_vm13, %v805_v62, %v803_v6  ;;  %v3140_v22 = vmul.f32 0.0078125, %v3632_v43  ;;  %v3143_v3 = vmul.f32 %v445_v35, %v3082_v45 }
 0x1ab   : > { %v3108_v56 = vadd.f32 1e-06, %v806_v48  ;;  %v475_v7 = vmul.f32 %v443_v61, %v3091_v9  ;;  %v3146_v39 = vmul.f32 %v444_v63, %v3088_v18  ;;  %v538_v57 = vmul.f32 0.007874016, %v506_v25 }
 0x1ac   : > { %v1591_v34 = vadd.f32 %v1559_v12, %v1527_v5  ;;  %v537_v44 = vmul.f32 0.007874016, %v505_v17  ;;  %v3149_v16 = vmul.f32 %v446_v32, %v3104_v54  ;;  %v3153_v23 = vmul.f32 128.0, %v3129_v15 }
 0x1ad   : > { %1868 = vrcp.f32 %v3108_v56  ;;  %v507_v47 = vsub.f32 %v372_v46, %v475_v7  ;;  %v3156_v62 = vmul.f32 128.0, %v3132_v36  ;;  %v3159_v51 = vmul.f32 128.0, %v3135_v14 }
 0x1ae   : > { %1623 = vst [vmem:[%s2668_s7 + $0x80] sm:$0xff] %v1591_v34  ;;  %1870 = vrsqrt.f32 %v3110_v20  ;;  %vm1252_vm14 = vweird.f32 %v3108_v56  ;;  %v3163_v5 = vmax.f32 %v538_v57, 0.0  ;;  %v3165_v38 = vmax.f32 %v537_v44, 0.0 }
 0x1af   : > { %1872 = vrsqrt.f32 %v3115_v28  ;;  %v1256_v19 = vand.u32 2147483647, %v3108_v56  ;;  %v1258_v4 = vand.u32 2147483648, %v3108_v56  ;;  %v539_v48 = vmul.f32 0.007874016, %v507_v47 }
 0x1b0   : > { %1874 = vrsqrt.f32 %v3117_v59  ;;  %vm826_vm0 = vcmp.eq.f32.partialorder %v3110_v20, inf  ;;  %vm828_vm1 = vcmp.eq.f32.partialorder %v3110_v20, 0.0  ;;  %v829_v55 = vand.u32 2147483648, %v3110_v20 }
 0x1b1   : > { %1876 = vrsqrt.f32 %v3163_v5  ;;  %vm1257_vm2 = vcmp.eq.f32.partialorder %v1256_v19, 8.507059e+37  ;;  %v1259_v63 = vor.u32 1.1754944e-38, %v1258_v4  ;;  %vm814_vm4 = vcmp.eq.f32.partialorder %v3115_v28, inf  ;;  %v1934_v19 = vld [vmem:[%s2167_s5 + $0x90] sm:$0xff] }
 0x1b2   : > { %1878 = vrsqrt.f32 %v3165_v38  ;;  %v3179_v29 = vmax.f32 %v539_v48, 0.0  ;;  %vm816_vm5 = vcmp.eq.f32.partialorder %v3115_v28, 0.0  ;;  %v817_v1 = vand.u32 2147483648, %v3115_v28 }
 0x1b3   : > { %v1869_v58 = vpop.eup %1868  ;;  %vm838_vm6 = vcmp.eq.f32.partialorder %v3117_v59, inf  ;;  %vm840_vm7 = vcmp.eq.f32.partialorder %v3117_v59, 0.0  ;;  %vm862_vm8 = vcmp.eq.f32.partialorder %v3163_v5, inf  ;;  %vm864_vm9 = vcmp.eq.f32.partialorder %v3163_v5, 0.0 }
 0x1b4   : > { %v1871_v42 = vpop.eup %1870  ;;  %v1248_v53 = vmul.f32 %v1869_v58, %v3108_v56  ;;  %vm1253_vm15 = vweird.f32 %v1869_v58  ;;  %v376_v56 = vpop.xlane.xlu1 %375  ;;  %1880 = vrsqrt.f32 %v3179_v29  ;;  %vm850_vm10 = vcmp.eq.f32.partialorder %v3165_v38, inf }
 0x1b5   : > { %v1873_v30 = vpop.eup %1872  ;;  %v820_v10 = vmul.f32 %v1871_v42, %v3110_v20  ;;  %vm1254_vm3 = vmor %vm1252_vm14, %vm1253_vm15  ;;  %vm852_vm11 = vcmp.eq.f32.partialorder %v3165_v38, 0.0 }
 0x1b6   : > { %v1875_v12 = vpop.eup %1874  ;;  %v1249_v24 = vsub.f32 1.0, %v1248_v53  ;;  %v808_v6 = vmul.f32 %v1873_v30, %v3115_v28  ;;  %v841_v53 = vand.u32 2147483648, %v3117_v59 }
 0x1b7   : > { %v821_v49 = vmul.f32 %v1871_v42, %v820_v10  ;;  %v832_v34 = vmul.f32 %v1875_v12, %v3117_v59  ;;  %v1877_v27 = vpop.eup %1876 }
 0x1b8   : > { %v1250_v41 = vmul.f32 %v1869_v58, %v1249_v24  ;;  %v809_v21 = vmul.f32 %v1873_v30, %v808_v6  ;;  %v3187_v57 = vpop.eup %1878 }
 0x1b9   : > { %v822_v26 = vmul.f32 0.5, %v821_v49  ;;  %v833_v61 = vmul.f32 %v1875_v12, %v832_v34 }
 0x1ba   : > { %v1251_v35 = vadd.f32 %v1869_v58, %v1250_v41  ;;  %v810_v50 = vmul.f32 0.5, %v809_v21 }
 0x1bb   : > { %v823_v2 = vsub.f32 1.5, %v822_v26  ;;  %v834_v37 = vmul.f32 0.5, %v833_v61 }
 0x1bc   : > { %v1255_v32 = vsel %vm1254_vm3, %v1869_v58, %v1251_v35  ;;  %v811_v40 = vsub.f32 1.5, %v810_v50  ;;  %v856_v58 = vmul.f32 %v1877_v27, %v3163_v5  ;;  %v3220_v50 = vpop.eup %1880 }
 0x1bd   : > { %v1260_v46 = vsel %vm1257_vm2, %v1259_v63, %v1255_v32  ;;  %v824_v25 = vmul.f32 %v1871_v42, %v823_v2  ;;  %v835_v17 = vsub.f32 1.5, %v834_v37  ;;  %v3229_v2 = vmul.f32 128.0, %v3140_v22  ;;  %v374_v32 = vpop.xlane.xlu0 %373 }
 0x1be   : > { %v1463_v7 = vmul.f32 %v2500_v60, %v1260_v46  ;;  %v812_v43 = vmul.f32 %v1873_v30, %v811_v40  ;;  %v857_v24 = vmul.f32 %v1877_v27, %v856_v58  ;;  %v509_v30 = vsub.f32 %v376_v56, %v3143_v3  ;;  %v378_v40 = vpop.xlane.xlu2 %377 }
 0x1bf   : > { %v825_v44 = vmul.f32 %v824_v25, %v3110_v20  ;;  %v836_v47 = vmul.f32 %v1875_v12, %v835_v17  ;;  %v844_v12 = vmul.f32 %v3187_v57, %v3165_v38 }
 0x1c0   : > { %v1496_v42 = vmul.f32 %v1463_v7, %v3010_v33  ;;  %v813_v10 = vmul.f32 %v812_v43, %v3115_v28  ;;  %v1561_v4 = vmul.f32 %v1934_v19, %v1463_v7  ;;  %v858_v48 = vmul.f32 0.5, %v857_v24 }
 0x1c1   : > { %v827_v6 = vsel %vm826_vm0, %v3110_v20, %v825_v44  ;;  %v837_v49 = vmul.f32 %v836_v47, %v3117_v59  ;;  %v845_v61 = vmul.f32 %v3187_v57, %v844_v12  ;;  %v541_v37 = vmul.f32 0.007874016, %v509_v30 }
 0x1c2   : > { %v1529_v34 = vsub.f32 %v2527_v31, %v1496_v42  ;;  %v830_v33 = vsel %vm828_vm1, %v829_v55, %v827_v6  ;;  %v815_v3 = vsel %vm814_vm4, %v3115_v28, %v813_v10  ;;  %v859_v63 = vsub.f32 1.5, %v858_v48 }
 0x1c3   : > { %v3208_v41 = vadd.f32 1e-06, %v830_v33  ;;  %v818_v21 = vsel %vm816_vm5, %v817_v1, %v815_v3  ;;  %v839_v26 = vsel %vm838_vm6, %v3117_v59, %v837_v49  ;;  %v3226_v28 = vmul.f32 %v3153_v23, %v3129_v15 }
 0x1c4   : > { %v1593_v35 = vadd.f32 %v1561_v4, %v1529_v34  ;;  %v3216_v20 = vadd.f32 1e-06, %v818_v21  ;;  %v842_v55 = vsel %vm840_vm7, %v841_v53, %v839_v26  ;;  %v865_v59 = vand.u32 2147483648, %v3163_v5 }
 0x1c5   : > { %1882 = vrcp.f32 %v3208_v41  ;;  %v1286_v1 = vand.u32 2147483648, %v3208_v41  ;;  %v3236_v46 = vadd.f32 1e-06, %v842_v55  ;;  %v860_v25 = vmul.f32 %v1877_v27, %v859_v63 }
 0x1c6   : > { %1625 = vst [vmem:[%s2668_s7 + $0x90] sm:$0xff] %v1593_v35  ;;  %1884 = vrcp.f32 %v3216_v20  ;;  %v853_v23 = vand.u32 2147483648, %v3165_v38  ;;  %v1284_v17 = vand.u32 2147483647, %v3208_v41  ;;  %v846_v56 = vmul.f32 0.5, %v845_v61 }
 0x1c7   : > { %v868_v7 = vmul.f32 %v3220_v50, %v3179_v29  ;;  %v877_v43 = vand.u32 2147483648, %v3179_v29  ;;  %v1270_v58 = vand.u32 2147483647, %v3216_v20  ;;  %1886 = vrcp.f32 %v3236_v46 }
 0x1c8   : > { %v508_v44 = vsub.f32 %v374_v32, %v3146_v39  ;;  %v510_v27 = vsub.f32 %v378_v40, %v3149_v16  ;;  %v861_v47 = vmul.f32 %v860_v25, %v3163_v5  ;;  %v847_v53 = vsub.f32 1.5, %v846_v56 }
 0x1c9   : > { %v869_v42 = vmul.f32 %v3220_v50, %v868_v7  ;;  %v3251_v10 = vmax.f32 %v541_v37, 0.0  ;;  %vm1280_vm12 = vweird.f32 %v3208_v41  ;;  %v1287_v30 = vor.u32 1.1754944e-38, %v1286_v1 }
 0x1ca   : > { %vm1266_vm13 = vweird.f32 %v3216_v20  ;;  %v1272_v19 = vand.u32 2147483648, %v3216_v20  ;;  %vm3257_vm14 = vcmp.eq.f32.partialorder %v1284_v17, 8.507059e+37  ;;  %v1298_v6 = vand.u32 2147483647, %v3236_v46 }
 0x1cb   : > { %v1883_v24 = vpop.eup %1882  ;;  %v863_v49 = vsel %vm862_vm8, %v3163_v5, %v861_v47  ;;  %v848_v12 = vmul.f32 %v3187_v57, %v847_v53  ;;  %vm3267_vm15 = vcmp.eq.f32.partialorder %v1270_v58, 8.507059e+37  ;;  %v1300_v3 = vand.u32 2147483648, %v3236_v46 }
 0x1cc   : > { %v1885_v39 = vpop.eup %1884  ;;  %v1276_v16 = vmul.f32 %v1883_v24, %v3208_v41  ;;  %v866_v48 = vsel %vm864_vm9, %v865_v59, %v863_v49  ;;  %v870_v21 = vmul.f32 0.5, %v869_v42  ;;  %1888 = vrsqrt.f32 %v3251_v10 }
 0x1cd   : > { %v1262_v34 = vmul.f32 %v1885_v39, %v3216_v20  ;;  %v3274_v61 = vadd.f32 1e-06, %v866_v48  ;;  %v849_v35 = vmul.f32 %v848_v12, %v3165_v38  ;;  %v1887_v57 = vpop.eup %1886  ;;  %v1273_v63 = vor.u32 1.1754944e-38, %v1272_v19 }
 0x1ce   : > { %v1277_v26 = vsub.f32 1.0, %v1276_v16  ;;  %vm1294_vm0 = vweird.f32 %v3236_v46  ;;  %v871_v37 = vsub.f32 1.5, %v870_v21  ;;  %vm1281_vm1 = vweird.f32 %v1883_v24 }
 0x1cf   : > { %v1263_v55 = vsub.f32 1.0, %v1262_v34  ;;  %v1290_v40 = vmul.f32 %v1887_v57, %v3236_v46  ;;  %1890 = vrcp.f32 %v3274_v61  ;;  %vm1267_vm2 = vweird.f32 %v1885_v39  ;;  %vm1282_vm5 = vmor %vm1280_vm12, %vm1281_vm1 }
 0x1d0   : > { %v1278_v32 = vmul.f32 %v1883_v24, %v1277_v26  ;;  %vm3281_vm3 = vcmp.eq.f32.partialorder %v1298_v6, 8.507059e+37  ;;  %v1301_v1 = vor.u32 1.1754944e-38, %v1300_v3  ;;  %v851_v56 = vsel %vm850_vm10, %v3165_v38, %v849_v35  ;;  %vm1268_vm6 = vmor %vm1266_vm13, %vm1267_vm2  ;;  %v1935_v35 = vld [vmem:[%s2167_s5 + $0xa0] sm:$0xff] }
 0x1d1   : > { %v1264_v5 = vmul.f32 %v1885_v39, %v1263_v55  ;;  %v1291_v17 = vsub.f32 1.0, %v1290_v40  ;;  %vm874_vm4 = vcmp.eq.f32.partialorder %v3179_v29, inf  ;;  %v540_v7 = vmul.f32 0.007874016, %v508_v44 }
 0x1d2   : > { %v1279_v25 = vadd.f32 %v1883_v24, %v1278_v32  ;;  %v854_v47 = vsel %vm852_vm11, %v853_v23, %v851_v56  ;;  %v872_v53 = vmul.f32 %v3220_v50, %v871_v37  ;;  %v3294_v42 = vmul.f32 0.007874016, %v510_v27  ;;  %v3296_v19 = vpop.eup %1888 }
 0x1d3   : > { %v1265_v58 = vadd.f32 %v1885_v39, %v1264_v5  ;;  %v1292_v6 = vmul.f32 %v1887_v57, %v1291_v17  ;;  %vm1295_vm7 = vweird.f32 %v1887_v57  ;;  %v3301_v44 = vadd.f32 1e-06, %v854_v47 }
 0x1d4   : > { %v1283_v16 = vsel %vm1282_vm5, %v1883_v24, %v1279_v25  ;;  %vm1322_vm8 = vweird.f32 %v3274_v61  ;;  %v1326_v50 = vand.u32 2147483647, %v3274_v61  ;;  %vm876_vm9 = vcmp.eq.f32.partialorder %v3179_v29, 0.0  ;;  %vm1296_vm10 = vmor %vm1294_vm0, %vm1295_vm7  ;;  %v380_v25 = vpop.xlane.xlu0 %379 }
 0x1d5   : > { %v1288_v41 = vsel %vm3257_vm14, %v1287_v30, %v1283_v16  ;;  %v1269_v38 = vsel %vm1268_vm6, %v1885_v39, %v1265_v58  ;;  %v1891_v23 = vpop.eup %1890  ;;  %v1293_v24 = vadd.f32 %v1887_v57, %v1292_v6  ;;  %1892 = vrcp.f32 %v3301_v44 }
 0x1d6   : > { %v1465_v27 = vmul.f32 %v2500_v60, %v1288_v41  ;;  %v1274_v20 = vsel %vm3267_vm15, %v1273_v63, %v1269_v38  ;;  %v1318_v30 = vmul.f32 %v1891_v23, %v3274_v61  ;;  %v873_v39 = vmul.f32 %v872_v53, %v3179_v29  ;;  %v1936_v63 = vld [vmem:[%s2167_s5 + $0x98] sm:$0xff] }
 0x1d7   : > { %v1464_v4 = vmul.f32 %v2500_v60, %v1274_v20  ;;  %v892_v49 = vmul.f32 %v3296_v19, %v3251_v10  ;;  %v1297_v34 = vsel %vm1296_vm10, %v1887_v57, %v1293_v24  ;;  %v1328_v33 = vand.u32 2147483648, %v3274_v61 }
 0x1d8   : > { %v1498_v12 = vmul.f32 %v1465_v27, %v3060_v13  ;;  %v3321_v3 = vmax.f32 %v540_v7, 0.0  ;;  %v1302_v46 = vsel %vm3281_vm3, %v1301_v1, %v1297_v34  ;;  %v1319_v21 = vsub.f32 1.0, %v1318_v30  ;;  %v1937_v7 = vld [vmem:[%s2167_s5 + $0xa8] sm:$0xff] }
 0x1d9   : > { %v1497_v48 = vmul.f32 %v1464_v4, %v3063_v0  ;;  %vm1323_vm11 = vweird.f32 %v1891_v23  ;;  %v1563_v55 = vmul.f32 %v1935_v35, %v1465_v27  ;;  %v1562_v37 = vmul.f32 %v1936_v63, %v1464_v4 }
 0x1da   : > { %v1531_v26 = vsub.f32 %v2527_v31, %v1498_v12  ;;  %v1466_v13 = vmul.f32 %v2500_v60, %v1302_v46  ;;  %v1320_v32 = vmul.f32 %v1891_v23, %v1319_v21  ;;  %v875_v0 = vsel %vm874_vm4, %v3179_v29, %v873_v39  ;;  %vm1324_vm13 = vmor %vm1322_vm8, %vm1323_vm11 }
 0x1db   : > { %v1530_v57 = vsub.f32 %v2527_v31, %v1497_v48  ;;  %v893_v40 = vmul.f32 %v3296_v19, %v892_v49  ;;  %v1893_v5 = vpop.eup %1892  ;;  %vm3336_vm12 = vcmp.eq.f32.partialorder %v1326_v50, 8.507059e+37  ;;  %v1329_v17 = vor.u32 1.1754944e-38, %v1328_v33  ;;  %v1938_v48 = vld [vmem:[%s2167_s5 + $0xb8] sm:$0xff] }
 0x1dc   : > { %v1595_v59 = vadd.f32 %v1563_v55, %v1531_v26  ;;  %v1499_v1 = vmul.f32 %v1466_v13, %v3066_v11  ;;  %v1564_v58 = vmul.f32 %v1937_v7, %v1466_v13  ;;  %v1321_v47 = vadd.f32 %v1891_v23, %v1320_v32 }
 0x1dd   : > { %v1594_v56 = vadd.f32 %v1562_v37, %v1530_v57  ;;  %v1304_v53 = vmul.f32 %v1893_v5, %v3301_v44  ;;  %v878_v11 = vsel %vm876_vm9, %v877_v43, %v875_v0  ;;  %v894_v6 = vmul.f32 0.5, %v893_v40 }
 0x1de   : > { %1627 = vst [vmem:[%s2668_s7 + $0xa0] sm:$0xff] %v1595_v59  ;;  %v1532_v16 = vsub.f32 %v2527_v31, %v1499_v1  ;;  %1894 = vrsqrt.f32 %v3321_v3  ;;  %v1325_v41 = vsel %vm1324_vm13, %v1891_v23, %v1321_v47  ;;  %v1312_v50 = vand.u32 2147483647, %v3301_v44  ;;  %v382_v23 = vpop.xlane.xlu1 %381  ;;  %v1939_v47 = vld [vmem:[%s2167_s5 + $0xb0] sm:$0xff] }
 0x1df   : > { %1626 = vst [vmem:[%s2668_s7 + $0x98] sm:$0xff] %v1594_v56  ;;  %v1305_v38 = vsub.f32 1.0, %v1304_v53  ;;  %v3354_v27 = vadd.f32 1e-06, %v878_v11  ;;  %v1330_v61 = vsel %vm3336_vm12, %v1329_v17, %v1325_v41  ;;  %v1314_v24 = vand.u32 2147483648, %v3301_v44 }
 0x1e0   : > { %v1596_v20 = vadd.f32 %v1564_v58, %v1532_v16  ;;  %v895_v4 = vsub.f32 1.5, %v894_v6  ;;  %v1468_v29 = vmul.f32 %v2500_v60, %v1330_v61  ;;  %vm1309_vm14 = vweird.f32 %v1893_v5  ;;  %v384_v61 = vpop.xlane.xlu2 %383 }
 0x1e1   : > { %v1306_v43 = vmul.f32 %v1893_v5, %v1305_v38  ;;  %1896 = vrcp.f32 %v3354_v27  ;;  %vm1308_vm15 = vweird.f32 %v3301_v44  ;;  %vm898_vm0 = vcmp.eq.f32.partialorder %v3251_v10, inf }
 0x1e2   : > { %1628 = vst [vmem:[%s2668_s7 + $0xa8] sm:$0xff] %v1596_v20  ;;  %v896_v30 = vmul.f32 %v3296_v19, %v895_v4  ;;  %v901_v39 = vand.u32 2147483648, %v3251_v10  ;;  %v1501_v49 = vmul.f32 %v1468_v29, %v3076_v52  ;;  %vm1313_vm1 = vcmp.eq.f32.partialorder %v1312_v50, 8.507059e+37  ;;  %vm1310_vm2 = vmor %vm1308_vm15, %vm1309_vm14 }
 0x1e3   : > { %v1307_v12 = vadd.f32 %v1893_v5, %v1306_v43  ;;  %v3368_v34 = vmax.f32 %v3294_v42, 0.0  ;;  %v1566_v46 = vmul.f32 %v1938_v48, %v1468_v29  ;;  %v1315_v21 = vor.u32 1.1754944e-38, %v1314_v24 }
 0x1e4   : > { %v1895_v33 = vpop.eup %1894  ;;  %v897_v44 = vmul.f32 %v896_v30, %v3251_v10  ;;  %v512_v19 = vsub.f32 %v382_v23, %v3226_v28  ;;  %v1534_v26 = vsub.f32 %v2527_v31, %v1501_v49  ;;  %vm900_vm3 = vcmp.eq.f32.partialorder %v3251_v10, 0.0 }
 0x1e5   : > { %v1311_v35 = vsel %vm1310_vm2, %v1893_v5, %v1307_v12  ;;  %v880_v52 = vmul.f32 %v1895_v33, %v3321_v3  ;;  %1898 = vrsqrt.f32 %v3368_v34  ;;  %v479_v40 = vmul.f32 %v3156_v62, %v3132_v36 }
 0x1e6   : > { %v1316_v42 = vsel %vm1313_vm1, %v1315_v21, %v1311_v35  ;;  %v899_v55 = vsel %vm898_vm0, %v3251_v10, %v897_v44  ;;  %v1598_v37 = vadd.f32 %v1566_v46, %v1534_v26  ;;  %v481_v5 = vmul.f32 %v3159_v51, %v3135_v14 }
 0x1e7   : > { %v1897_v63 = vpop.eup %1896  ;;  %v1467_v13 = vmul.f32 %v2500_v60, %v1316_v42  ;;  %v902_v28 = vsel %vm900_vm3, %v901_v39, %v899_v55  ;;  %v881_v57 = vmul.f32 %v1895_v33, %v880_v52  ;;  %v544_v1 = vmul.f32 0.007874016, %v512_v19 }
 0x1e8   : > { %v1332_v32 = vmul.f32 %v1897_v63, %v3354_v27  ;;  %v3383_v0 = vadd.f32 1e-06, %v902_v28  ;;  %1630 = vst [vmem:[%s2668_s7 + $0xb8] sm:$0xff] %v1598_v37  ;;  %v3393_v17 = vmul.f32 %v3229_v2, %v3140_v22  ;;  %v1340_v7 = vand.u32 2147483647, %v3354_v27 }
 0x1e9   : > { %v1500_v10 = vmul.f32 %v1467_v13, %v3079_v8  ;;  %v882_v59 = vmul.f32 0.5, %v881_v57  ;;  %v1342_v58 = vand.u32 2147483648, %v3354_v27  ;;  %v1565_v53 = vmul.f32 %v1939_v47, %v1467_v13  ;;  %v1940_v57 = vld [vmem:[%s2167_s5 + $0xc0] sm:$0xff] }
 0x1ea   : > { %v1333_v56 = vsub.f32 1.0, %v1332_v32  ;;  %1900 = vrcp.f32 %v3383_v0  ;;  %v3400_v16 = vmax.f32 %v544_v1, 0.0  ;;  %vm1337_vm4 = vweird.f32 %v1897_v63 }
 0x1eb   : > { %v1899_v62 = vpop.eup %1898  ;;  %v1533_v51 = vsub.f32 %v2527_v31, %v1500_v10  ;;  %v883_v8 = vsub.f32 1.5, %v882_v59  ;;  %v511_v6 = vsub.f32 %v380_v25, %v479_v40  ;;  %vm886_vm5 = vcmp.eq.f32.partialorder %v3321_v3, inf  ;;  %v386_v10 = vpop.xlane.xlu0 %385 }
 0x1ec   : > { %v1334_v11 = vmul.f32 %v1897_v63, %v1333_v56  ;;  %v904_v2 = vmul.f32 %v1899_v62, %v3368_v34  ;;  %1902 = vrsqrt.f32 %v3400_v16  ;;  %vm1336_vm6 = vweird.f32 %v3354_v27 }
 0x1ed   : > { %v1597_v41 = vadd.f32 %v1565_v53, %v1533_v51  ;;  %v884_v38 = vmul.f32 %v1895_v33, %v883_v8  ;;  %vm888_vm7 = vcmp.eq.f32.partialorder %v3321_v3, 0.0  ;;  %vm1338_vm8 = vmor %vm1336_vm6, %vm1337_vm4  ;;  %v1343_v24 = vor.u32 1.1754944e-38, %v1342_v58 }
 0x1ee   : > { %v1335_v50 = vadd.f32 %v1897_v63, %v1334_v11  ;;  %v905_v20 = vmul.f32 %v1899_v62, %v904_v2  ;;  %v889_v29 = vand.u32 2147483648, %v3321_v3  ;;  %v543_v43 = vmul.f32 0.007874016, %v511_v6 }
 0x1ef   : > { %1629 = vst [vmem:[%s2668_s7 + $0xb0] sm:$0xff] %v1597_v41  ;;  %v885_v4 = vmul.f32 %v884_v38, %v3321_v3  ;;  %vm1341_vm9 = vcmp.eq.f32.partialorder %v1340_v7, 8.507059e+37  ;;  %vm910_vm10 = vcmp.eq.f32.partialorder %v3368_v34, inf  ;;  %v513_v33 = vsub.f32 %v384_v61, %v481_v5 }
 0x1f0   : > { %v1901_v23 = vpop.eup %1900  ;;  %v1339_v30 = vsel %vm1338_vm8, %v1897_v63, %v1335_v50  ;;  %v906_v39 = vmul.f32 0.5, %v905_v20  ;;  %vm912_vm11 = vcmp.eq.f32.partialorder %v3368_v34, 0.0  ;;  %v1368_v26 = vand.u32 2147483647, %v3383_v0 }
 0x1f1   : > { %v1344_v49 = vsel %vm1341_vm9, %v1343_v24, %v1339_v30  ;;  %v1360_v27 = vmul.f32 %v1901_v23, %v3383_v0  ;;  %v887_v12 = vsel %vm886_vm5, %v3321_v3, %v885_v4  ;;  %v3422_v52 = vmax.f32 %v543_v43, 0.0  ;;  %v1941_v24 = vld [vmem:[%s2167_s5 + $0xd0] sm:$0xff] }
 0x1f2   : > { %v1469_v48 = vmul.f32 %v2500_v60, %v1344_v49  ;;  %v890_v46 = vsel %vm888_vm7, %v889_v29, %v887_v12  ;;  %v907_v21 = vsub.f32 1.5, %v906_v39  ;;  %v1903_v44 = vpop.eup %1902  ;;  %v1370_v55 = vand.u32 2147483648, %v3383_v0 }
 0x1f3   : > { %v1361_v19 = vsub.f32 1.0, %v1360_v27  ;;  %v3420_v35 = vadd.f32 1e-06, %v890_v46  ;;  %v928_v3 = vmul.f32 %v1903_v44, %v3400_v16  ;;  %vm1365_vm12 = vweird.f32 %v1901_v23 }
 0x1f4   : > { %v1502_v42 = vmul.f32 %v1469_v48, %v3091_v9  ;;  %v908_v63 = vmul.f32 %v1899_v62, %v907_v21  ;;  %v545_v13 = vmul.f32 0.007874016, %v513_v33  ;;  %v1567_v32 = vmul.f32 %v1940_v57, %v1469_v48 }
 0x1f5   : > { %v1362_v37 = vmul.f32 %v1901_v23, %v1361_v19  ;;  %1904 = vrcp.f32 %v3420_v35  ;;  %v929_v5 = vmul.f32 %v1903_v44, %v928_v3  ;;  %vm1364_vm13 = vweird.f32 %v3383_v0 }
 0x1f6   : > { %v1535_v28 = vsub.f32 %v2527_v31, %v1502_v42  ;;  %v909_v40 = vmul.f32 %v908_v63, %v3368_v34  ;;  %v913_v59 = vand.u32 2147483648, %v3368_v34  ;;  %1906 = vrsqrt.f32 %v3422_v52  ;;  %vm1366_vm14 = vmor %vm1364_vm13, %vm1365_vm12 }
 0x1f7   : > { %v1363_v9 = vadd.f32 %v1901_v23, %v1362_v37  ;;  %v1371_v25 = vor.u32 1.1754944e-38, %v1370_v55  ;;  %v930_v7 = vmul.f32 0.5, %v929_v5  ;;  %vm1369_vm15 = vcmp.eq.f32.partialorder %v1368_v26, 8.507059e+37 }
 0x1f8   : > { %v1599_v1 = vadd.f32 %v1567_v32, %v1535_v28  ;;  %v911_v56 = vsel %vm910_vm10, %v3368_v34, %v909_v40  ;;  %v514_v51 = vsub.f32 %v386_v10, %v3393_v17  ;;  %v3443_v8 = vmax.f32 %v545_v13, 0.0 }
 0x1f9   : > { %v1367_v58 = vsel %vm1366_vm14, %v1901_v23, %v1363_v9  ;;  %v914_v62 = vsel %vm912_vm11, %v913_v59, %v911_v56  ;;  %v931_v53 = vsub.f32 1.5, %v930_v7  ;;  %vm934_vm0 = vcmp.eq.f32.partialorder %v3400_v16, inf  ;;  %v1942_v7 = vld [vmem:[%s2167_s5 + $0xc8] sm:$0xff] }
 0x1fa   : > { %1631 = vst [vmem:[%s2668_s7 + $0xc0] sm:$0xff] %v1599_v1  ;;  %v1372_v0 = vsel %vm1369_vm15, %v1371_v25, %v1367_v58  ;;  %v3441_v47 = vadd.f32 1e-06, %v914_v62  ;;  %v546_v17 = vmul.f32 0.007874016, %v514_v51  ;;  %v1356_v43 = vand.u32 2147483648, %v3420_v35 }
 0x1fb   : > { %v1905_v11 = vpop.eup %1904  ;;  %v1471_v2 = vmul.f32 %v2500_v60, %v1372_v0  ;;  %v932_v50 = vmul.f32 %v1903_v44, %v931_v53  ;;  %v1354_v29 = vand.u32 2147483647, %v3420_v35  ;;  %vm936_vm2 = vcmp.eq.f32.partialorder %v3400_v16, 0.0 }
 0x1fc   : > { %v1346_v6 = vmul.f32 %v1905_v11, %v3420_v35  ;;  %1908 = vrcp.f32 %v3441_v47  ;;  %v1907_v41 = vpop.eup %1906  ;;  %vm1351_vm1 = vweird.f32 %v1905_v11  ;;  %v937_v49 = vand.u32 2147483648, %v3400_v16 }
 0x1fd   : > { %v1504_v34 = vmul.f32 %v1471_v2, %v3082_v45  ;;  %v916_v20 = vmul.f32 %v1907_v41, %v3422_v52  ;;  %1910 = vrsqrt.f32 %v3443_v8  ;;  %v1569_v4 = vmul.f32 %v1941_v24, %v1471_v2 }
 0x1fe   : > { %v1347_v38 = vsub.f32 1.0, %v1346_v6  ;;  %v933_v45 = vmul.f32 %v932_v50, %v3400_v16  ;;  %v3459_v27 = vmax.f32 %v546_v17, 0.0  ;;  %vm1350_vm3 = vweird.f32 %v3420_v35 }
 0x1ff   : > { %v1537_v61 = vsub.f32 %v2527_v31, %v1504_v34  ;;  %v917_v30 = vmul.f32 %v1907_v41, %v916_v20  ;;  %vm1352_vm4 = vmor %vm1350_vm3, %vm1351_vm1  ;;  %v1357_v21 = vor.u32 1.1754944e-38, %v1356_v43  ;;  %vm1355_vm5 = vcmp.eq.f32.partialorder %v1354_v29, 8.507059e+37 }
 0x200   : > { %v1348_v23 = vmul.f32 %v1905_v11, %v1347_v38  ;;  %v935_v48 = vsel %vm934_vm0, %v3400_v16, %v933_v45  ;;  %1912 = vrsqrt.f32 %v3459_v27  ;;  %v1382_v13 = vand.u32 2147483647, %v3441_v47  ;;  %v1943_v45 = vld [vmem:[%s2167_s5 + $0xd8] sm:$0xff] }
 0x201   : > { %v1601_v39 = vadd.f32 %v1569_v4, %v1537_v61  ;;  %v918_v46 = vmul.f32 0.5, %v917_v30  ;;  %v938_v19 = vsel %vm936_vm2, %v937_v49, %v935_v48  ;;  %v1384_v28 = vand.u32 2147483648, %v3441_v47 }
 0x202   : > { %v1909_v12 = vpop.eup %1908  ;;  %v1349_v33 = vadd.f32 %v1905_v11, %v1348_v23  ;;  %v3468_v55 = vadd.f32 1e-06, %v938_v19  ;;  %vm922_vm7 = vcmp.eq.f32.partialorder %v3422_v52, inf  ;;  %vm924_vm8 = vcmp.eq.f32.partialorder %v3422_v52, 0.0 }
 0x203   : > { %1633 = vst [vmem:[%s2668_s7 + $0xd0] sm:$0xff] %v1601_v39  ;;  %v1374_v44 = vmul.f32 %v1909_v12, %v3441_v47  ;;  %v1911_v26 = vpop.eup %1910  ;;  %v919_v63 = vsub.f32 1.5, %v918_v46  ;;  %vm1379_vm6 = vweird.f32 %v1909_v12  ;;  %v925_v10 = vand.u32 2147483648, %v3422_v52 }
 0x204   : > { %v1353_v42 = vsel %vm1352_vm4, %v1905_v11, %v1349_v33  ;;  %v940_v37 = vmul.f32 %v1911_v26, %v3443_v8  ;;  %1914 = vrcp.f32 %v3468_v55  ;;  %vm1378_vm9 = vweird.f32 %v3441_v47 }
 0x205   : > { %v1358_v35 = vsel %vm1355_vm5, %v1357_v21, %v1353_v42  ;;  %v1375_v3 = vsub.f32 1.0, %v1374_v44  ;;  %v920_v32 = vmul.f32 %v1907_v41, %v919_v63  ;;  %vm1380_vm10 = vmor %vm1378_vm9, %vm1379_vm6  ;;  %vm1383_vm11 = vcmp.eq.f32.partialorder %v1382_v13, 8.507059e+37 }
 0x206   : > { %v1470_v16 = vmul.f32 %v2500_v60, %v1358_v35  ;;  %v941_v40 = vmul.f32 %v1911_v26, %v940_v37  ;;  %v1913_v9 = vpop.eup %1912  ;;  %vm946_vm12 = vcmp.eq.f32.partialorder %v3443_v8, inf  ;;  %v949_v4 = vand.u32 2147483648, %v3443_v8 }
 0x207   : > { %v1376_v57 = vmul.f32 %v1909_v12, %v1375_v3  ;;  %v921_v1 = vmul.f32 %v920_v32, %v3422_v52  ;;  %v952_v62 = vmul.f32 %v1913_v9, %v3459_v27  ;;  %v1412_v29 = vand.u32 2147483648, %v3468_v55 }
 0x208   : > { %v1503_v5 = vmul.f32 %v1470_v16, %v3088_v18  ;;  %v942_v25 = vmul.f32 0.5, %v941_v40  ;;  %v1568_v58 = vmul.f32 %v1942_v7, %v1470_v16  ;;  %v1385_v18 = vor.u32 1.1754944e-38, %v1384_v28 }
 0x209   : > { %v1377_v59 = vadd.f32 %v1909_v12, %v1376_v57  ;;  %v923_v0 = vsel %vm922_vm7, %v3422_v52, %v921_v1  ;;  %v953_v41 = vmul.f32 %v1913_v9, %v952_v62  ;;  %v1410_v52 = vand.u32 2147483647, %v3468_v55 }
 0x20a   : > { %v1536_v56 = vsub.f32 %v2527_v31, %v1503_v5  ;;  %v943_v47 = vsub.f32 1.5, %v942_v25  ;;  %v1915_v53 = vpop.eup %1914  ;;  %v926_v6 = vsel %vm924_vm8, %v925_v10, %v923_v0  ;;  %vm1406_vm14 = vweird.f32 %v3468_v55  ;;  %v1944_v5 = vld [vmem:[%s2167_s5 + $0xe8] sm:$0xff] }
 0x20b   : > { %v1381_v51 = vsel %vm1380_vm10, %v1909_v12, %v1377_v59  ;;  %v1402_v17 = vmul.f32 %v1915_v53, %v3468_v55  ;;  %v991_v38 = vadd.f32 1e-06, %v926_v6  ;;  %v954_v20 = vmul.f32 0.5, %v953_v41  ;;  %v1945_v6 = vld [vmem:[%s2167_s5 + $0xe0] sm:$0xff] }
 0x20c   : > { %v1600_v11 = vadd.f32 %v1568_v58, %v1536_v56  ;;  %v1386_v2 = vsel %vm1383_vm11, %v1385_v18, %v1381_v51  ;;  %v944_v50 = vmul.f32 %v1911_v26, %v943_v47  ;;  %vm1407_vm13 = vweird.f32 %v1915_v53 }
 0x20d   : > { %v1472_v34 = vmul.f32 %v2500_v60, %v1386_v2  ;;  %v1403_v24 = vsub.f32 1.0, %v1402_v17  ;;  %1916 = vrcp.f32 %v991_v38  ;;  %v955_v49 = vsub.f32 1.5, %v954_v20  ;;  %vm1408_vm0 = vmor %vm1406_vm14, %vm1407_vm13 }
 0x20e   : > { %1632 = vst [vmem:[%s2668_s7 + $0xc8] sm:$0xff] %v1600_v11  ;;  %v945_v43 = vmul.f32 %v944_v50, %v3443_v8  ;;  %vm948_vm15 = vcmp.eq.f32.partialorder %v3443_v8, 0.0  ;;  %v1413_v21 = vor.u32 1.1754944e-38, %v1412_v29  ;;  %vm1411_vm1 = vcmp.eq.f32.partialorder %v1410_v52, 8.507059e+37 }
 0x20f   : > { %v1505_v61 = vmul.f32 %v1472_v34, %v3104_v54  ;;  %v1570_v30 = vmul.f32 %v1943_v45, %v1472_v34  ;;  %v1404_v39 = vmul.f32 %v1915_v53, %v1403_v24  ;;  %v956_v46 = vmul.f32 %v1913_v9, %v955_v49  ;;  %v1946_v45 = vld [vmem:[%s2167_s5 + $0xf0] sm:$0xff] }
 0x210   : > { %v947_v54 = vsel %vm946_vm12, %v3443_v8, %v945_v43  ;;  %vm958_vm2 = vcmp.eq.f32.partialorder %v3459_v27, inf  ;;  %v961_v37 = vand.u32 2147483648, %v3459_v27  ;;  %v1398_v13 = vand.u32 2147483648, %v991_v38 }
 0x211   : > { %v1538_v23 = vsub.f32 %v2527_v31, %v1505_v61  ;;  %v1405_v33 = vadd.f32 %v1915_v53, %v1404_v39  ;;  %v950_v48 = vsel %vm948_vm15, %v949_v4, %v947_v54  ;;  %v957_v42 = vmul.f32 %v956_v46, %v3459_v27  ;;  %v1947_v46 = vld [vmem:[%s2167_s5 + $0xf8] sm:$0xff] }
 0x212   : > { %v993_v44 = vadd.f32 1e-06, %v950_v48  ;;  %vm960_vm3 = vcmp.eq.f32.partialorder %v3459_v27, 0.0  ;;  %v1396_v57 = vand.u32 2147483647, %v991_v38  ;;  %vm1392_vm5 = vweird.f32 %v991_v38 }
 0x213   : > { %v1602_v12 = vadd.f32 %v1570_v30, %v1538_v23  ;;  %v1917_v19 = vpop.eup %1916  ;;  %v1409_v26 = vsel %vm1408_vm0, %v1915_v53, %v1405_v33  ;;  %v959_v3 = vsel %vm958_vm2, %v3459_v27, %v957_v42  ;;  %v1399_v56 = vor.u32 1.1754944e-38, %v1398_v13 }
 0x214   : > { %v1414_v55 = vsel %vm1411_vm1, %v1413_v21, %v1409_v26  ;;  %v1388_v63 = vmul.f32 %v1917_v19, %v991_v38  ;;  %1918 = vrcp.f32 %v993_v44  ;;  %vm1393_vm4 = vweird.f32 %v1917_v19 }
 0x215   : > { %1634 = vst [vmem:[%s2668_s7 + $0xd8] sm:$0xff] %v1602_v12  ;;  %v1474_v8 = vmul.f32 %v2500_v60, %v1414_v55  ;;  %v962_v32 = vsel %vm960_vm3, %v961_v37, %v959_v3  ;;  %vm1394_vm6 = vmor %vm1392_vm5, %vm1393_vm4  ;;  %vm1397_vm7 = vcmp.eq.f32.partialorder %v1396_v57, 8.507059e+37  ;;  %v1426_v62 = vand.u32 2147483648, %v993_v44 }
 0x216   : > { %v1389_v35 = vsub.f32 1.0, %v1388_v63  ;;  %v994_v9 = vadd.f32 1e-06, %v962_v32  ;;  %v1424_v0 = vand.u32 2147483647, %v993_v44  ;;  %vm1420_vm9 = vweird.f32 %v993_v44 }
 0x217   : > { %v1507_v16 = vmul.f32 %v1474_v8, %v3129_v15  ;;  %v1572_v10 = vmul.f32 %v1944_v5, %v1474_v8  ;;  %v1427_v34 = vor.u32 1.1754944e-38, %v1426_v62 }
 0x218   : > { %v1390_v28 = vmul.f32 %v1917_v19, %v1389_v35  ;;  %1920 = vrcp.f32 %v994_v9  ;;  %vm1425_vm11 = vcmp.eq.f32.partialorder %v1424_v0, 8.507059e+37  ;;  %v1440_v24 = vand.u32 2147483648, %v994_v9 }
 0x219   : > { %v1540_v40 = vsub.f32 %v2527_v31, %v1507_v16  ;;  %v1438_v52 = vand.u32 2147483647, %v994_v9  ;;  %vm1434_vm13 = vweird.f32 %v994_v9 }
 0x21a   : > { %v1919_v59 = vpop.eup %1918  ;;  %v1391_v1 = vadd.f32 %v1917_v19, %v1390_v28  ;;  %v1441_v39 = vor.u32 1.1754944e-38, %v1440_v24 }
 0x21b   : > { %v1604_v25 = vadd.f32 %v1572_v10, %v1540_v40  ;;  %v1416_v15 = vmul.f32 %v1919_v59, %v993_v44  ;;  %vm1421_vm8 = vweird.f32 %v1919_v59  ;;  %vm1439_vm15 = vcmp.eq.f32.partialorder %v1438_v52, 8.507059e+37 }
 0x21c   : > { %v1395_v27 = vsel %vm1394_vm6, %v1917_v19, %v1391_v1  ;;  %vm1422_vm10 = vmor %vm1420_vm9, %vm1421_vm8 }
 0x21d   : > { %1636 = vst [vmem:[%s2668_s7 + $0xe8] sm:$0xff] %v1604_v25  ;;  %v1400_v7 = vsel %vm1397_vm7, %v1399_v56, %v1395_v27  ;;  %v1417_v58 = vsub.f32 1.0, %v1416_v15 }
 0x21e   : > { %v1473_v18 = vmul.f32 %v2500_v60, %v1400_v7  ;;  %v1921_v53 = vpop.eup %1920 }
 0x21f   : > { %v1418_v51 = vmul.f32 %v1919_v59, %v1417_v58  ;;  %v1430_v17 = vmul.f32 %v1921_v53, %v994_v9  ;;  %vm1435_vm12 = vweird.f32 %v1921_v53 }
 0x220   : > { %v1506_v47 = vmul.f32 %v1473_v18, %v3132_v36  ;;  %v1571_v41 = vmul.f32 %v1945_v6, %v1473_v18  ;;  %vm1436_vm14 = vmor %vm1434_vm13, %vm1435_vm12 }
 0x221   : > { %v1419_v11 = vadd.f32 %v1919_v59, %v1418_v51  ;;  %v1431_v61 = vsub.f32 1.0, %v1430_v17 }
 0x222   : > { %v1539_v2 = vsub.f32 %v2527_v31, %v1506_v47 }
 0x223   : > { %v1423_v38 = vsel %vm1422_vm10, %v1919_v59, %v1419_v11  ;;  %v1432_v4 = vmul.f32 %v1921_v53, %v1431_v61 }
 0x224   : > { %v1603_v50 = vadd.f32 %v1571_v41, %v1539_v2  ;;  %v1428_v20 = vsel %vm1425_vm11, %v1427_v34, %v1423_v38 }
 0x225   : > { %v1475_v36 = vmul.f32 %v2500_v60, %v1428_v20  ;;  %v1433_v43 = vadd.f32 %v1921_v53, %v1432_v4 }
 0x226   : > { %1635 = vst [vmem:[%s2668_s7 + $0xe0] sm:$0xff] %v1603_v50 }
 0x227   : > { %v1508_v29 = vmul.f32 %v1475_v36, %v3135_v14  ;;  %v1573_v30 = vmul.f32 %v1946_v45, %v1475_v36  ;;  %v1437_v49 = vsel %vm1436_vm14, %v1921_v53, %v1433_v43 }
 0x228   : > { %v1442_v12 = vsel %vm1439_vm15, %v1441_v39, %v1437_v49 }
 0x229   : > { %v1541_v23 = vsub.f32 %v2527_v31, %v1508_v29  ;;  %v1476_v14 = vmul.f32 %v2500_v60, %v1442_v12 }
 0x22b   : > { %v1605_v54 = vadd.f32 %v1573_v30, %v1541_v23  ;;  %v1509_v33 = vmul.f32 %v1476_v14, %v3140_v22  ;;  %v1574_v21 = vmul.f32 %v1947_v46, %v1476_v14 }
 0x22d   : > { %1637 = vst [vmem:[%s2668_s7 + $0xf0] sm:$0xff] %v1605_v54  ;;  %v1542_v48 = vsub.f32 %v2527_v31, %v1509_v33 }
 0x22f   : > { %v1606_v44 = vadd.f32 %v1574_v21, %v1542_v48 }
 0x231   : > { %1638 = vst [vmem:[%s2668_s7 + $0xf8] sm:$0xff] %v1606_v44 }
 0x232   : > { %2005 = shalt.err (!%p2002_p4)
}
 0x233   : > { %s2048_s29 = smov 128   ;;  %s2049_s30 = smov 8  }
 0x234   : > { %1746 = dma.vmem_to_hbm [thread:$0]  (%p2125_p10), %s1653_s1, 4096, %s1655_s12, %s1640_s13, %s2048_s29, %s2048_s29, %s2049_s30  }
 0x235 PF: > { %p1757_p5 = scmp.ge.s32.totalorder %s2044_s19, 2  ;;  %s1669_s4 = sand.u32 1, %s2032_s16  }
 0x236   : > { %s1670_s5 = scalar_lea.sflag [#allocation6], %s1669_s4 }
 0x237   : > { %p1753_p7 = pnand %p1757_p5, %p2129_p11 }
 0x239   : > { %p1754_p8 = pneg %p1753_p7 }
 0x23b   : > { %2027 = dma.done.wait (%p1754_p8), %s1670_s5, 4096  }
 0x23c   : > { %2029 = vsyncadd (%p1754_p8), %s1670_s5, 4294963200  ;;  %p18_p9 = scmp.ge.s32.totalorder %s2101_s20, 6   ;;  %s3641_s16 = smov %s2036_s17 }
 0x23d   : > { %s3642_s17 = smov %s2040_s18  ;;  %s3643_s18 = smov %s2113_s23 }
 0x23e   : > { %s3644_s19 = smov %s2101_s20  ;;  %20 = sbr.rel (!%p18_p9) target bundleno = 8 (0x8), region = 77 }
 0x243   :  { %1676 = vsyncpa [#allocation5], 1 }
 0x244   :  { %1678 = vsyncpa [#allocation5 + $0x1], 1 }
 0x245   :  { %1679 = vsyncpa [#allocation6], 1 }
 0x246   :  { %1681 = vsyncpa [#allocation6 + $0x1], 1 }

</bundles_post_ra>
